<compile_context>
chip_gen: v7x
topology: tpu7x:2x2x1
jax: 0.10.0
libtpu: 0.0.40
codegen_flags: <defaults>
</compile_context>

<pallas_src>
import functools
import math

import jax
import jax.numpy as jnp
from jax import lax
from jax.experimental import pallas as pl
from jax.experimental.pallas import tpu as pltpu


def _vmem_limit_bytes():
    """Generation-aware VMEM limit with headroom for compiler scratch."""
    cap = 128 * 1024 * 1024
    try:
        info = pltpu.get_tpu_info()
        cap = int(getattr(info, "vmem_capacity_bytes", cap))
    except Exception:
        pass
    return int(max(32 * 1024 * 1024, min(0.8 * cap, 112 * 1024 * 1024)))


def _sum_all(a):
    """Full 2-D sum -> (1, 1), as two axis reductions (robust lowering)."""
    return jnp.sum(jnp.sum(a, axis=1, keepdims=True), axis=0, keepdims=True)


def _cgnlx_main_kernel(x_ref, wpg_ref, wt_ref, wz_ref, gn_ref,
                       y_ref, sb_ref, acc_ref, *,
                       cp_pad, order, alphas, eps, n_norm,
                       hw_real, hw_padded, tile_hw):
    """Grid = (B, 2, HW/tile).

    x_ref:   (1, Cin, T)       input tile, f32
    wpg_ref: (2*Cp', Cin)      fused phi/g 1x1-conv weights, bf16
    wt_ref:  (Cp', Cin)        theta 1x1-conv weight, bf16
    wz_ref:  (Cin, Cp')        z 1x1-conv weight (transposed, padded), bf16
    gn_ref:  (Cin, 2)          GroupNorm (weight, bias) packed, f32
    y_ref:   (1, Cin, T)       un-normalized y tile (written in sweep 1)
    sb_ref:  (1, Cin, 2)       folded per-channel (scale, bias) (last tile)
    acc_ref: (order+4, 128)    VMEM accumulator: rows [0..order] att sums,
                               [order+1]=s1, [order+2]=s2, [order+3]=shift
    """
    s = pl.program_id(1)
    j = pl.program_id(2)
    n_j = pl.num_programs(2)

    i_s1, i_s2, i_sh = order + 1, order + 2, order + 3

    def _read(i):                       # scratch row -> (1, 1) f32
        return acc_ref[i:i + 1, :][:, :1]

    @pl.when(jnp.logical_and(s == 0, j == 0))
    def _reset():
        acc_ref[...] = jnp.zeros_like(acc_ref)

    has_pad = hw_padded != hw_real      # static
    if has_pad:
        col = j * tile_hw + lax.broadcasted_iota(jnp.int32, (1, tile_hw), 1)
        valid = col < hw_real

    @pl.when(s == 0)
    def _sweep_pg():
        xb = x_ref[0].astype(jnp.bfloat16)                       # (Cin, T)
        r = jnp.dot(wpg_ref[...], xb,
                    preferred_element_type=jnp.float32)          # (2Cp', T)
        p = r[:cp_pad]
        g = r[cp_pad:]
        pg = g                                                   # p^0 * g
        for o in range(order + 1):
            acc_ref[o:o + 1, :] += alphas[o] * _sum_all(pg)      # f32 accum
            if o < order:
                pg = pg * p

    @pl.when(s == 1)
    def _sweep_t():
        xb = x_ref[0].astype(jnp.bfloat16)
        t = jnp.dot(wt_ref[...], xb,
                    preferred_element_type=jnp.float32)          # (Cp', T)
        # Horner evaluation of  out = sum_o (att_o * alpha_o) * t^o
        c = [_read(o) * (alphas[o] * alphas[o]) for o in range(order + 1)]
        if order == 0:
            out = c[0] + jnp.zeros_like(t)
        else:
            out = t * c[order] + c[order - 1]
            for o in range(order - 2, -1, -1):
                out = out * t + c[o]
        if has_pad:
            # Constant Taylor term makes padded columns non-zero: mask them
            # so GN statistics and y stay exact.
            out = jnp.where(valid, out, 0.0)
        y = jnp.dot(wz_ref[...], out.astype(jnp.bfloat16),
                    preferred_element_type=jnp.float32)          # (Cin, T)

        # Shifted single-pass GroupNorm statistics (cancellation-safe).
        @pl.when(j == 0)
        def _set_shift():
            acc_ref[i_sh:i_sh + 1, :] = jnp.broadcast_to(
                _sum_all(y) / y.size, (1, acc_ref.shape[1]))

        shift = _read(i_sh)
        yc = y - shift
        if has_pad:
            yc = jnp.where(valid, yc, 0.0)
        acc_ref[i_s1:i_s1 + 1, :] += _sum_all(yc)
        acc_ref[i_s2:i_s2 + 1, :] += _sum_all(yc * yc)

        y_ref[0] = y                                             # lane-dense

        # Finalize: fold GN mean/var + affine into per-channel scale/bias.
        @pl.when(j == n_j - 1)
        def _finalize():
            m_c = _read(i_s1) / n_norm
            var = jnp.maximum(_read(i_s2) / n_norm - m_c * m_c, 0.0)
            mean = m_c + _read(i_sh)
            inv = lax.rsqrt(var + eps)                           # (1, 1)
            gn = gn_ref[...]                                     # (Cin, 2)
            scale = gn[:, :1] * inv                              # (Cin, 1)
            bias = gn[:, 1:2] - mean * scale                     # (Cin, 1)
            sb_ref[0, :, 0:1] = scale
            sb_ref[0, :, 1:2] = bias


def _cgnlx_norm_kernel(y_ref, x_ref, sb_ref, o_ref):
    """out = y * scale + bias + residual (GN affine folded; 3 ops/element)."""
    sb = sb_ref[0]                                               # (Cin, 2)
    scale = sb[:, :1]
    bias = sb[:, 1:2]
    o_ref[0] = y_ref[0] * scale + bias + x_ref[0]


@functools.partial(jax.jit, static_argnames=("order", "gamma", "eps", "tile_hw"))
def spatial_cgnlx(x_nchw, wt, wp, wg, wz, gn_w, gn_b, *,
                  order=2, gamma=1e-4, eps=1e-5, tile_hw=512):
    """SpatialCGNLx forward (groups=1). x_nchw: (B, Cin, H, W) float32."""
    b, cin, h, w = x_nchw.shape
    cp = wt.shape[1]
    hw = h * w

    # Sublane-align Cp (for v5e deployments keep Cp >= 128 for MXU K-util).
    cp_pad = max(8, -(-cp // 8) * 8)
    # Lane-aligned HW tile; pad HW so every tile is full (masked stats cover
    # the padded tail).
    hw_pad128 = -(-hw // 128) * 128
    tile = max(128, (min(tile_hw, hw_pad128) // 128) * 128)
    hw_pad = -(-hw // tile) * tile
    n_tiles = hw_pad // tile

    # NCHW -> (B, Cin, HW): reshape only; HW lands on the 128-lane axis.
    x = x_nchw.reshape(b, cin, hw).astype(jnp.float32)
    if hw_pad != hw:
        x = jnp.pad(x, ((0, 0), (0, 0), (0, hw_pad - hw)))

    def _pad_rows(m, rows):
        return jnp.pad(m, ((0, rows - m.shape[0]), (0, 0)))

    # phi/g fused (sweep 0) and theta (sweep 1) 1x1-conv weights, bf16.
    w_pg = jnp.concatenate([_pad_rows(wp.T, cp_pad),
                            _pad_rows(wg.T, cp_pad)],
                           axis=0).astype(jnp.bfloat16)          # (2Cp', Cin)
    w_t = _pad_rows(wt.T, cp_pad).astype(jnp.bfloat16)           # (Cp', Cin)
    # z weight transposed to (Cin, Cp'); padded columns are zero.
    wz_t = jnp.pad(wz.T, ((0, 0), (0, cp_pad - cp))).astype(jnp.bfloat16)
    # GroupNorm affine packed into one (Cin, 2) block (one small DMA).
    gn = jnp.stack([gn_w, gn_b], axis=1).astype(jnp.float32)

    # Taylor coefficients of the Gaussian RBF kernel (host-side constants).
    beta = math.exp(-2.0 * gamma)
    alphas = tuple(math.sqrt(((2.0 * gamma) ** o) / math.factorial(o) * beta)
                   for o in range(order + 1))

    vlim = _vmem_limit_bytes()
    kernel1 = functools.partial(
        _cgnlx_main_kernel, cp_pad=cp_pad, order=order, alphas=alphas,
        eps=float(eps), n_norm=float(cin * hw), hw_real=hw, hw_padded=hw_pad,
        tile_hw=tile)

    y, sb = pl.pallas_call(
        kernel1,
        out_shape=(jax.ShapeDtypeStruct((b, cin, hw_pad), jnp.float32),
                   jax.ShapeDtypeStruct((b, cin, 2), jnp.float32)),
        grid=(b, 2, n_tiles),
        in_specs=[
            pl.BlockSpec((1, cin, tile), lambda bi, s, j: (bi, 0, j)),    # x
            pl.BlockSpec((2 * cp_pad, cin), lambda bi, s, j: (0, 0)),     # phi/g
            pl.BlockSpec((cp_pad, cin), lambda bi, s, j: (0, 0)),         # theta
            pl.BlockSpec((cin, cp_pad), lambda bi, s, j: (0, 0)),         # z
            pl.BlockSpec((cin, 2), lambda bi, s, j: (0, 0)),              # gn
        ],
        out_specs=(
            # y tiles are only produced in sweep 1 (s==1); pin the block
            # index at 0 during sweep 0 so no garbage/extra writeback occurs.
            pl.BlockSpec((1, cin, tile), lambda bi, s, j: (bi, 0, j * s)),
            pl.BlockSpec((1, cin, 2), lambda bi, s, j: (bi, 0, 0)),
        ),
        scratch_shapes=[pltpu.VMEM((order + 4, 128), jnp.float32)],
        compiler_params=pltpu.CompilerParams(
            dimension_semantics=("parallel", "arbitrary", "arbitrary"),
            vmem_limit_bytes=vlim),
    )(x, w_pg, w_t, wz_t, gn)

    # Second tiny pass: out = y*scale + bias + residual (aliases y's buffer).
    out = pl.pallas_call(
        _cgnlx_norm_kernel,
        out_shape=jax.ShapeDtypeStruct((b, cin, hw_pad), jnp.float32),
        grid=(b, n_tiles),
        in_specs=[
            pl.BlockSpec((1, cin, tile), lambda bi, j: (bi, 0, j)),       # y
            pl.BlockSpec((1, cin, tile), lambda bi, j: (bi, 0, j)),       # x
            pl.BlockSpec((1, cin, 2), lambda bi, j: (bi, 0, 0)),          # sb
        ],
        out_specs=pl.BlockSpec((1, cin, tile), lambda bi, j: (bi, 0, j)),
        input_output_aliases={0: 0},
        compiler_params=pltpu.CompilerParams(
            dimension_semantics=("parallel", "parallel"),
            vmem_limit_bytes=vlim),
    )(y, x, sb)

    if hw_pad != hw:
        out = out[:, :, :hw]
    return out.reshape(b, cin, h, w)


def _reference(x, wt, wp, wg, wz, gn_w, gn_b, order, gamma, eps=1e-5):
    """Pure-JAX, torch-faithful (NCHW, c*h*w flattening) f32 reference."""
    b, cin, h, w = x.shape
    cp = wt.shape[1]
    t = jnp.einsum('bihw,io->bohw', x, wt)
    p = jnp.einsum('bihw,io->bohw', x, wp)
    g = jnp.einsum('bihw,io->bohw', x, wg)
    tf = t.reshape(b, 1, cp * h * w)
    pf = p.reshape(b, 1, cp * h * w)
    gf = g.reshape(b, cp * h * w, 1)
    beta = math.exp(-2.0 * gamma)
    t_tay, p_tay = [], []
    for o in range(order + 1):
        alpha = math.sqrt(((2.0 * gamma) ** o) / math.factorial(o) * beta)
        t_tay.append((tf ** o) * alpha)
        p_tay.append((pf ** o) * alpha)
    t_tay = jnp.concatenate(t_tay, axis=1)              # (b, order+1, chw)
    p_tay = jnp.concatenate(p_tay, axis=1)
    att = jnp.einsum('bok,bkl->bol', p_tay, gf).reshape(b, 1, order + 1)
    y = jnp.einsum('bij,bjk->bik', att, t_tay).reshape(b, cp, h, w)
    z = jnp.einsum('bphw,pi->bihw', y, wz)
    mean = z.mean(axis=(1, 2, 3), keepdims=True)
    var = ((z - mean) ** 2).mean(axis=(1, 2, 3), keepdims=True)
    zn = (z - mean) / jnp.sqrt(var + eps)
    zn = zn * gn_w[None, :, None, None] + gn_b[None, :, None, None]
    return zn + x


if __name__ == "__main__":
    def _run_case(key, b, cin, cp, h, w, order, gamma, tile_hw):
        kx, kt, kp, kg, kz, ka, kb = jax.random.split(key, 7)
        x = jax.random.normal(kx, (b, cin, h, w), dtype=jnp.float32)
        wt = jax.random.normal(kt, (cin, cp), dtype=jnp.float32) / math.sqrt(cin)
        wp = jax.random.normal(kp, (cin, cp), dtype=jnp.float32) / math.sqrt(cin)
        wg = jax.random.normal(kg, (cin, cp), dtype=jnp.float32) / math.sqrt(cin)
        wz = jax.random.normal(kz, (cp, cin), dtype=jnp.float32) / math.sqrt(cp)
        gn_w = 1.0 + 0.1 * jax.random.normal(ka, (cin,), dtype=jnp.float32)
        gn_b = 0.1 * jax.random.normal(kb, (cin,), dtype=jnp.float32)

        out = spatial_cgnlx(x, wt, wp, wg, wz, gn_w, gn_b,
                            order=order, gamma=gamma, tile_hw=tile_hw)
        out = jax.block_until_ready(out)

        ref = _reference(x, wt, wp, wg, wz, gn_w, gn_b, order, gamma)
        ref = jax.block_until_ready(ref)

        assert out.shape == (b, cin, h, w)
        err = float(jnp.max(jnp.abs(out - ref)))
        # bf16 MXU matmuls (f32 accumulation) loosen accuracy slightly vs the
        # all-f32 reference, hence the 2e-2 tolerance.
        assert jnp.allclose(out, ref, rtol=2e-2, atol=2e-2), err

    key = jax.random.PRNGKey(0)
    k1, k2 = jax.random.split(key)
    # Multi-HW-tile case: exercises the two-sweep scratch accumulation.
    _run_case(k1, b=2, cin=8, cp=4, h=16, w=16, order=2, gamma=1e-4,
              tile_hw=128)
    # HW not a multiple of 128: exercises lane padding + masked statistics.
    _run_case(k2, b=2, cin=8, cp=4, h=12, w=12, order=2, gamma=1e-4,
              tile_hw=128)

    print("KERNEL_OK")
</pallas_src>

<mosaic_0001>
module attributes {stable_mosaic.version = 11 : i64} {
  func.func @_cgnlx_norm_kernel(%arg0: i32, %arg1: i32, %arg2: memref<1x8x128xf32, #tpu.memory_space<vmem>>, %arg3: memref<1x8x128xf32, #tpu.memory_space<vmem>>, %arg4: memref<1x8x2xf32, #tpu.memory_space<vmem>>, %arg5: memref<1x8x128xf32, #tpu.memory_space<vmem>>) attributes {dimension_semantics = [#tpu.dimension_semantics<parallel>, #tpu.dimension_semantics<parallel>], iteration_bounds = array<i64: 2, 2>, scalar_prefetch = 0 : i64, scratch_operands = 0 : i64, tpu.core_type = #tpu.core_type<tc>, window_params = [{transform_indices = @transform_0, window_bounds = array<i64: 1, 8, 128>}, {transform_indices = @transform_1, window_bounds = array<i64: 1, 8, 128>}, {transform_indices = @transform_2, window_bounds = array<i64: 1, 8, 2>}, {transform_indices = @transform_3, window_bounds = array<i64: 1, 8, 128>}]} {
    %c0 = arith.constant 0 : index
    %c0_0 = arith.constant 0 : index
    %c0_1 = arith.constant 0 : index
    %0 = vector.load %arg4[%c0, %c0_0, %c0_1] : memref<1x8x2xf32, #tpu.memory_space<vmem>>, vector<1x8x2xf32>
    %1 = vector.shape_cast %0 : vector<1x8x2xf32> to vector<8x2xf32>
    %2 = vector.extract_strided_slice %1 {offsets = [0, 0], sizes = [8, 1], strides = [1, 1]} : vector<8x2xf32> to vector<8x1xf32>
    %3 = vector.extract_strided_slice %1 {offsets = [0, 1], sizes = [8, 1], strides = [1, 1]} : vector<8x2xf32> to vector<8x1xf32>
    %c0_2 = arith.constant 0 : index
    %c0_3 = arith.constant 0 : index
    %c0_4 = arith.constant 0 : index
    %4 = vector.load %arg2[%c0_2, %c0_3, %c0_4] : memref<1x8x128xf32, #tpu.memory_space<vmem>>, vector<1x8x128xf32>
    %5 = vector.shape_cast %4 : vector<1x8x128xf32> to vector<8x128xf32>
    %6 = vector.broadcast %2 : vector<8x1xf32> to vector<8x128xf32>
    %7 = arith.mulf %5, %6 : vector<8x128xf32>
    %8 = vector.broadcast %3 : vector<8x1xf32> to vector<8x128xf32>
    %9 = arith.addf %7, %8 : vector<8x128xf32>
    %c0_5 = arith.constant 0 : index
    %c0_6 = arith.constant 0 : index
    %c0_7 = arith.constant 0 : index
    %10 = vector.load %arg3[%c0_5, %c0_6, %c0_7] : memref<1x8x128xf32, #tpu.memory_space<vmem>>, vector<1x8x128xf32>
    %11 = vector.shape_cast %10 : vector<1x8x128xf32> to vector<8x128xf32>
    %12 = arith.addf %9, %11 : vector<8x128xf32>
    %c0_8 = arith.constant 0 : index
    %c0_9 = arith.constant 0 : index
    %c0_10 = arith.constant 0 : index
    %13 = vector.load %arg5[%c0_8, %c0_9, %c0_10] : memref<1x8x128xf32, #tpu.memory_space<vmem>>, vector<1x8x128xf32>
    %14 = vector.shape_cast %13 : vector<1x8x128xf32> to vector<8x128xf32>
    %15 = vector.shape_cast %12 : vector<8x128xf32> to vector<1x8x128xf32>
    tpu.vector_store %arg5[%c0_8, %c0_9, %c0_10], %15 {strides = array<i32>} : memref<1x8x128xf32, #tpu.memory_space<vmem>>, vector<1x8x128xf32>,
    return
  }
  func.func @transform_0(%arg0: i32, %arg1: i32) -> (i32, i32, i32) {
    %c0_i32 = arith.constant 0 : i32
    %c0_i32_0 = arith.constant 0 : i32
    return %arg0, %c0_i32, %arg1 : i32, i32, i32
  }
  func.func @transform_1(%arg0: i32, %arg1: i32) -> (i32, i32, i32) {
    %c0_i32 = arith.constant 0 : i32
    %c0_i32_0 = arith.constant 0 : i32
    return %arg0, %c0_i32, %arg1 : i32, i32, i32
  }
  func.func @transform_2(%arg0: i32, %arg1: i32) -> (i32, i32, i32) {
    %c0_i32 = arith.constant 0 : i32
    %c0_i32_0 = arith.constant 0 : i32
    %c0_i32_1 = arith.constant 0 : i32
    return %arg0, %c0_i32, %c0_i32_0 : i32, i32, i32
  }
  func.func @transform_3(%arg0: i32, %arg1: i32) -> (i32, i32, i32) {
    %c0_i32 = arith.constant 0 : i32
    %c0_i32_0 = arith.constant 0 : i32
    return %arg0, %c0_i32, %arg1 : i32, i32, i32
  }
}

module attributes {stable_mosaic.version = 11 : i64} {
  func.func @_cgnlx_main_kernel(%arg0: i32, %arg1: i32, %arg2: i32, %arg3: memref<1x8x128xf32, #tpu.memory_space<vmem>>, %arg4: memref<16x8xbf16, #tpu.memory_space<vmem>>, %arg5: memref<8x8xbf16, #tpu.memory_space<vmem>>, %arg6: memref<8x8xbf16, #tpu.memory_space<vmem>>, %arg7: memref<8x2xf32, #tpu.memory_space<vmem>>, %arg8: memref<1x8x128xf32, #tpu.memory_space<vmem>>, %arg9: memref<1x8x2xf32, #tpu.memory_space<vmem>>, %arg10: memref<6x128xf32, #tpu.memory_space<vmem>>) attributes {dimension_semantics = [#tpu.dimension_semantics<parallel>, #tpu.dimension_semantics<arbitrary>, #tpu.dimension_semantics<arbitrary>], iteration_bounds = array<i64: 2, 2, 2>, scalar_prefetch = 0 : i64, scratch_operands = 1 : i64, tpu.core_type = #tpu.core_type<tc>, window_params = [{transform_indices = @transform_0, window_bounds = array<i64: 1, 8, 128>}, {pipeline_mode = #tpu.pipeline_mode<synchronous>, transform_indices = @transform_1, window_bounds = array<i64: 16, 8>}, {pipeline_mode = #tpu.pipeline_mode<synchronous>, transform_indices = @transform_2, window_bounds = array<i64: 8, 8>}, {pipeline_mode = #tpu.pipeline_mode<synchronous>, transform_indices = @transform_3, window_bounds = array<i64: 8, 8>}, {pipeline_mode = #tpu.pipeline_mode<synchronous>, transform_indices = @transform_4, window_bounds = array<i64: 8, 2>}, {transform_indices = @transform_5, window_bounds = array<i64: 1, 8, 128>}, {transform_indices = @transform_6, window_bounds = array<i64: 1, 8, 2>}]} {
    %c0_i32 = arith.constant 0 : i32
    %0 = arith.cmpi eq, %arg1, %c0_i32 : i32
    %c0_i32_0 = arith.constant 0 : i32
    %1 = arith.cmpi eq, %arg2, %c0_i32_0 : i32
    %2 = arith.andi %0, %1 : i1
    %3 = arith.extui %2 : i1 to i32
    %c0_i32_1 = arith.constant 0 : i32
    %4 = arith.cmpi ne, %3, %c0_i32_1 : i32
    scf.if %4 {
      %cst = arith.constant 0.000000e+00 : f32
      %11 = vector.broadcast %cst : f32 to vector<6x128xf32>
      %c0 = arith.constant 0 : index
      %c0_5 = arith.constant 0 : index
      %12 = vector.load %arg10[%c0, %c0_5] : memref<6x128xf32, #tpu.memory_space<vmem>>, vector<6x128xf32>
      tpu.vector_store %arg10[%c0, %c0_5], %11 {strides = array<i32>} : memref<6x128xf32, #tpu.memory_space<vmem>>, vector<6x128xf32>,
    } else {
    }
    %c0_i32_2 = arith.constant 0 : i32
    %5 = arith.cmpi eq, %arg1, %c0_i32_2 : i32
    %6 = arith.extui %5 : i1 to i32
    %c0_i32_3 = arith.constant 0 : i32
    %7 = arith.cmpi ne, %6, %c0_i32_3 : i32
    scf.if %7 {
      %c0 = arith.constant 0 : index
      %c0_5 = arith.constant 0 : index
      %c0_6 = arith.constant 0 : index
      %11 = vector.load %arg3[%c0, %c0_5, %c0_6] : memref<1x8x128xf32, #tpu.memory_space<vmem>>, vector<1x8x128xf32>
      %12 = vector.shape_cast %11 : vector<1x8x128xf32> to vector<8x128xf32>
      %13 = arith.truncf %12 : vector<8x128xf32> to vector<8x128xbf16>
      %c0_7 = arith.constant 0 : index
      %c0_8 = arith.constant 0 : index
      %14 = vector.load %arg4[%c0_7, %c0_8] : memref<16x8xbf16, #tpu.memory_space<vmem>>, vector<16x8xbf16>
      %cst = arith.constant dense<0.000000e+00> : vector<16x128xf32>
      %15 = tpu.matmul %14, %13, %cst {dimension_numbers = #tpu.dot_dimension_numbers<[1], [0], [0], [1], [0, 0, 1, 1], [], []>} : vector<16x8xbf16>, vector<8x128xbf16>, vector<16x128xf32> -> vector<16x128xf32>
      %16 = vector.extract_strided_slice %15 {offsets = [0, 0], sizes = [8, 128], strides = [1, 1]} : vector<16x128xf32> to vector<8x128xf32>
      %17 = vector.extract_strided_slice %15 {offsets = [8, 0], sizes = [8, 128], strides = [1, 1]} : vector<16x128xf32> to vector<8x128xf32>
      %c0_9 = arith.constant 0 : index
      %c0_10 = arith.constant 0 : index
      %18 = vector.load %arg10[%c0_9, %c0_10] : memref<6x128xf32, #tpu.memory_space<vmem>>, vector<1x128xf32>
      %cst_11 = arith.constant dense<0.000000e+00> : vector<8xf32>
      %19 = vector.multi_reduction <add>, %17, %cst_11 [1] : vector<8x128xf32> to vector<8xf32>
      %20 = vector.shape_cast %19 : vector<8xf32> to vector<8x1xf32>
      %cst_12 = arith.constant dense<0.000000e+00> : vector<1xf32>
      %21 = vector.multi_reduction <add>, %20, %cst_12 [0] : vector<8x1xf32> to vector<1xf32>
      %22 = vector.shape_cast %21 : vector<1xf32> to vector<1x1xf32>
      %cst_13 = arith.constant 0.999899983 : f32
      %23 = vector.broadcast %cst_13 : f32 to vector<1x1xf32>
      %24 = arith.mulf %23, %22 : vector<1x1xf32>
      %25 = vector.broadcast %24 : vector<1x1xf32> to vector<1x128xf32>
      %26 = arith.addf %18, %25 : vector<1x128xf32>
      %c0_14 = arith.constant 0 : index
      %c0_15 = arith.constant 0 : index
      %27 = vector.load %arg10[%c0_14, %c0_15] : memref<6x128xf32, #tpu.memory_space<vmem>>, vector<1x128xf32>
      tpu.vector_store %arg10[%c0_14, %c0_15], %26 {strides = array<i32>} : memref<6x128xf32, #tpu.memory_space<vmem>>, vector<1x128xf32>,
      %28 = arith.mulf %17, %16 : vector<8x128xf32>
      %c1 = arith.constant 1 : index
      %c0_16 = arith.constant 0 : index
      %29 = vector.load %arg10[%c1, %c0_16] : memref<6x128xf32, #tpu.memory_space<vmem>>, vector<1x128xf32>
      %cst_17 = arith.constant dense<0.000000e+00> : vector<8xf32>
      %30 = vector.multi_reduction <add>, %28, %cst_17 [1] : vector<8x128xf32> to vector<8xf32>
      %31 = vector.shape_cast %30 : vector<8xf32> to vector<8x1xf32>
      %cst_18 = arith.constant dense<0.000000e+00> : vector<1xf32>
      %32 = vector.multi_reduction <add>, %31, %cst_18 [0] : vector<8x1xf32> to vector<1xf32>
      %33 = vector.shape_cast %32 : vector<1xf32> to vector<1x1xf32>
      %cst_19 = arith.constant 0.0141407214 : f32
      %34 = vector.broadcast %cst_19 : f32 to vector<1x1xf32>
      %35 = arith.mulf %34, %33 : vector<1x1xf32>
      %36 = vector.broadcast %35 : vector<1x1xf32> to vector<1x128xf32>
      %37 = arith.addf %29, %36 : vector<1x128xf32>
      %c1_20 = arith.constant 1 : index
      %c0_21 = arith.constant 0 : index
      %38 = vector.load %arg10[%c1_20, %c0_21] : memref<6x128xf32, #tpu.memory_space<vmem>>, vector<1x128xf32>
      tpu.vector_store %arg10[%c1_20, %c0_21], %37 {strides = array<i32>} : memref<6x128xf32, #tpu.memory_space<vmem>>, vector<1x128xf32>,
      %39 = arith.mulf %28, %16 : vector<8x128xf32>
      %c2 = arith.constant 2 : index
      %c0_22 = arith.constant 0 : index
      %40 = vector.load %arg10[%c2, %c0_22] : memref<6x128xf32, #tpu.memory_space<vmem>>, vector<1x128xf32>
      %cst_23 = arith.constant dense<0.000000e+00> : vector<8xf32>
      %41 = vector.multi_reduction <add>, %39, %cst_23 [1] : vector<8x128xf32> to vector<8xf32>
      %42 = vector.shape_cast %41 : vector<8xf32> to vector<8x1xf32>
      %cst_24 = arith.constant dense<0.000000e+00> : vector<1xf32>
      %43 = vector.multi_reduction <add>, %42, %cst_24 [0] : vector<8x1xf32> to vector<1xf32>
      %44 = vector.shape_cast %43 : vector<1xf32> to vector<1x1xf32>
      %cst_25 = arith.constant 1.41407218E-4 : f32
      %45 = vector.broadcast %cst_25 : f32 to vector<1x1xf32>
      %46 = arith.mulf %45, %44 : vector<1x1xf32>
      %47 = vector.broadcast %46 : vector<1x1xf32> to vector<1x128xf32>
      %48 = arith.addf %40, %47 : vector<1x128xf32>
      %c2_26 = arith.constant 2 : index
      %c0_27 = arith.constant 0 : index
      %49 = vector.load %arg10[%c2_26, %c0_27] : memref<6x128xf32, #tpu.memory_space<vmem>>, vector<1x128xf32>
      tpu.vector_store %arg10[%c2_26, %c0_27], %48 {strides = array<i32>} : memref<6x128xf32, #tpu.memory_space<vmem>>, vector<1x128xf32>,
    } else {
    }
    %c1_i32 = arith.constant 1 : i32
    %8 = arith.cmpi eq, %arg1, %c1_i32 : i32
    %9 = arith.extui %8 : i1 to i32
    %c0_i32_4 = arith.constant 0 : i32
    %10 = arith.cmpi ne, %9, %c0_i32_4 : i32
    scf.if %10 {
      %c0 = arith.constant 0 : index
      %c0_5 = arith.constant 0 : index
      %c0_6 = arith.constant 0 : index
      %11 = vector.load %arg3[%c0, %c0_5, %c0_6] : memref<1x8x128xf32, #tpu.memory_space<vmem>>, vector<1x8x128xf32>
      %12 = vector.shape_cast %11 : vector<1x8x128xf32> to vector<8x128xf32>
      %13 = arith.truncf %12 : vector<8x128xf32> to vector<8x128xbf16>
      %c0_7 = arith.constant 0 : index
      %c0_8 = arith.constant 0 : index
      %14 = vector.load %arg5[%c0_7, %c0_8] : memref<8x8xbf16, #tpu.memory_space<vmem>>, vector<8x8xbf16>
      %cst = arith.constant dense<0.000000e+00> : vector<8x128xf32>
      %15 = tpu.matmul %14, %13, %cst {dimension_numbers = #tpu.dot_dimension_numbers<[1], [0], [0], [1], [0, 0, 1, 1], [], []>} : vector<8x8xbf16>, vector<8x128xbf16>, vector<8x128xf32> -> vector<8x128xf32>
      %c0_9 = arith.constant 0 : index
      %c0_10 = arith.constant 0 : index
      %16 = vector.load %arg10[%c0_9, %c0_10] : memref<6x128xf32, #tpu.memory_space<vmem>>, vector<1x128xf32>
      %17 = vector.extract_strided_slice %16 {offsets = [0, 0], sizes = [1, 1], strides = [1, 1]} : vector<1x128xf32> to vector<1x1xf32>
      %cst_11 = arith.constant 9.998000e-01 : f32
      %18 = vector.broadcast %cst_11 : f32 to vector<1x1xf32>
      %19 = arith.mulf %17, %18 : vector<1x1xf32>
      %c1 = arith.constant 1 : index
      %c0_12 = arith.constant 0 : index
      %20 = vector.load %arg10[%c1, %c0_12] : memref<6x128xf32, #tpu.memory_space<vmem>>, vector<1x128xf32>
      %21 = vector.extract_strided_slice %20 {offsets = [0, 0], sizes = [1, 1], strides = [1, 1]} : vector<1x128xf32> to vector<1x1xf32>
      %cst_13 = arith.constant 1.999600e-04 : f32
      %22 = vector.broadcast %cst_13 : f32 to vector<1x1xf32>
      %23 = arith.mulf %21, %22 : vector<1x1xf32>
      %c2 = arith.constant 2 : index
      %c0_14 = arith.constant 0 : index
      %24 = vector.load %arg10[%c2, %c0_14] : memref<6x128xf32, #tpu.memory_space<vmem>>, vector<1x128xf32>
      %25 = vector.extract_strided_slice %24 {offsets = [0, 0], sizes = [1, 1], strides = [1, 1]} : vector<1x128xf32> to vector<1x1xf32>
      %cst_15 = arith.constant 1.999600e-08 : f32
      %26 = vector.broadcast %cst_15 : f32 to vector<1x1xf32>
      %27 = arith.mulf %25, %26 : vector<1x1xf32>
      %28 = vector.broadcast %27 : vector<1x1xf32> to vector<8x128xf32>
      %29 = arith.mulf %15, %28 : vector<8x128xf32>
      %30 = vector.broadcast %23 : vector<1x1xf32> to vector<8x128xf32>
      %31 = arith.addf %29, %30 : vector<8x128xf32>
      %32 = arith.mulf %31, %15 : vector<8x128xf32>
      %33 = vector.broadcast %19 : vector<1x1xf32> to vector<8x128xf32>
      %34 = arith.addf %32, %33 : vector<8x128xf32>
      %c0_16 = arith.constant 0 : index
      %c0_17 = arith.constant 0 : index
      %35 = vector.load %arg6[%c0_16, %c0_17] : memref<8x8xbf16, #tpu.memory_space<vmem>>, vector<8x8xbf16>
      %36 = arith.truncf %34 : vector<8x128xf32> to vector<8x128xbf16>
      %cst_18 = arith.constant dense<0.000000e+00> : vector<8x128xf32>
      %37 = tpu.matmul %35, %36, %cst_18 {dimension_numbers = #tpu.dot_dimension_numbers<[1], [0], [0], [1], [0, 0, 1, 1], [], []>} : vector<8x8xbf16>, vector<8x128xbf16>, vector<8x128xf32> -> vector<8x128xf32>
      %c0_i32_19 = arith.constant 0 : i32
      %38 = arith.cmpi eq, %arg2, %c0_i32_19 : i32
      %39 = arith.extui %38 : i1 to i32
      %c0_i32_20 = arith.constant 0 : i32
      %40 = arith.cmpi ne, %39, %c0_i32_20 : i32
      scf.if %40 {
        %cst_37 = arith.constant dense<0.000000e+00> : vector<8xf32>
        %68 = vector.multi_reduction <add>, %37, %cst_37 [1] : vector<8x128xf32> to vector<8xf32>
        %69 = vector.shape_cast %68 : vector<8xf32> to vector<8x1xf32>
        %cst_38 = arith.constant dense<0.000000e+00> : vector<1xf32>
        %70 = vector.multi_reduction <add>, %69, %cst_38 [0] : vector<8x1xf32> to vector<1xf32>
        %71 = vector.shape_cast %70 : vector<1xf32> to vector<1x1xf32>
        %cst_39 = arith.constant 1.024000e+03 : f32
        %72 = vector.broadcast %cst_39 : f32 to vector<1x1xf32>
        %73 = arith.divf %71, %72 : vector<1x1xf32>
        %74 = vector.shape_cast %73 : vector<1x1xf32> to vector<1x1xf32>
        %75 = vector.broadcast %74 : vector<1x1xf32> to vector<1x128xf32>
        %c5_40 = arith.constant 5 : index
        %c0_41 = arith.constant 0 : index
        %76 = vector.load %arg10[%c5_40, %c0_41] : memref<6x128xf32, #tpu.memory_space<vmem>>, vector<1x128xf32>
        tpu.vector_store %arg10[%c5_40, %c0_41], %75 {strides = array<i32>} : memref<6x128xf32, #tpu.memory_space<vmem>>, vector<1x128xf32>,
      } else {
      }
      %c5 = arith.constant 5 : index
      %c0_21 = arith.constant 0 : index
      %41 = vector.load %arg10[%c5, %c0_21] : memref<6x128xf32, #tpu.memory_space<vmem>>, vector<1x128xf32>
      %42 = vector.extract_strided_slice %41 {offsets = [0, 0], sizes = [1, 1], strides = [1, 1]} : vector<1x128xf32> to vector<1x1xf32>
      %43 = vector.broadcast %42 : vector<1x1xf32> to vector<8x128xf32>
      %44 = arith.subf %37, %43 : vector<8x128xf32>
      %c3 = arith.constant 3 : index
      %c0_22 = arith.constant 0 : index
      %45 = vector.load %arg10[%c3, %c0_22] : memref<6x128xf32, #tpu.memory_space<vmem>>, vector<1x128xf32>
      %cst_23 = arith.constant dense<0.000000e+00> : vector<8xf32>
      %46 = vector.multi_reduction <add>, %44, %cst_23 [1] : vector<8x128xf32> to vector<8xf32>
      %47 = vector.shape_cast %46 : vector<8xf32> to vector<8x1xf32>
      %cst_24 = arith.constant dense<0.000000e+00> : vector<1xf32>
      %48 = vector.multi_reduction <add>, %47, %cst_24 [0] : vector<8x1xf32> to vector<1xf32>
      %49 = vector.shape_cast %48 : vector<1xf32> to vector<1x1xf32>
      %50 = vector.broadcast %49 : vector<1x1xf32> to vector<1x128xf32>
      %51 = arith.addf %45, %50 : vector<1x128xf32>
      %c3_25 = arith.constant 3 : index
      %c0_26 = arith.constant 0 : index
      %52 = vector.load %arg10[%c3_25, %c0_26] : memref<6x128xf32, #tpu.memory_space<vmem>>, vector<1x128xf32>
      tpu.vector_store %arg10[%c3_25, %c0_26], %51 {strides = array<i32>} : memref<6x128xf32, #tpu.memory_space<vmem>>, vector<1x128xf32>,
      %c4 = arith.constant 4 : index
      %c0_27 = arith.constant 0 : index
      %53 = vector.load %arg10[%c4, %c0_27] : memref<6x128xf32, #tpu.memory_space<vmem>>, vector<1x128xf32>
      %54 = arith.mulf %44, %44 : vector<8x128xf32>
      %cst_28 = arith.constant dense<0.000000e+00> : vector<8xf32>
      %55 = vector.multi_reduction <add>, %54, %cst_28 [1] : vector<8x128xf32> to vector<8xf32>
      %56 = vector.shape_cast %55 : vector<8xf32> to vector<8x1xf32>
      %cst_29 = arith.constant dense<0.000000e+00> : vector<1xf32>
      %57 = vector.multi_reduction <add>, %56, %cst_29 [0] : vector<8x1xf32> to vector<1xf32>
      %58 = vector.shape_cast %57 : vector<1xf32> to vector<1x1xf32>
      %59 = vector.broadcast %58 : vector<1x1xf32> to vector<1x128xf32>
      %60 = arith.addf %53, %59 : vector<1x128xf32>
      %c4_30 = arith.constant 4 : index
      %c0_31 = arith.constant 0 : index
      %61 = vector.load %arg10[%c4_30, %c0_31] : memref<6x128xf32, #tpu.memory_space<vmem>>, vector<1x128xf32>
      tpu.vector_store %arg10[%c4_30, %c0_31], %60 {strides = array<i32>} : memref<6x128xf32, #tpu.memory_space<vmem>>, vector<1x128xf32>,
      %c0_32 = arith.constant 0 : index
      %c0_33 = arith.constant 0 : index
      %c0_34 = arith.constant 0 : index
      %62 = vector.load %arg8[%c0_32, %c0_33, %c0_34] : memref<1x8x128xf32, #tpu.memory_space<vmem>>, vector<1x8x128xf32>
      %63 = vector.shape_cast %62 : vector<1x8x128xf32> to vector<8x128xf32>
      %64 = vector.shape_cast %37 : vector<8x128xf32> to vector<1x8x128xf32>
      tpu.vector_store %arg8[%c0_32, %c0_33, %c0_34], %64 {strides = array<i32>} : memref<1x8x128xf32, #tpu.memory_space<vmem>>, vector<1x8x128xf32>,
      %c1_i32_35 = arith.constant 1 : i32
      %65 = arith.cmpi eq, %arg2, %c1_i32_35 : i32
      %66 = arith.extui %65 : i1 to i32
      %c0_i32_36 = arith.constant 0 : i32
      %67 = arith.cmpi ne, %66, %c0_i32_36 : i32
      scf.if %67 {
        %c3_37 = arith.constant 3 : index
        %c0_38 = arith.constant 0 : index
        %68 = vector.load %arg10[%c3_37, %c0_38] : memref<6x128xf32, #tpu.memory_space<vmem>>, vector<1x128xf32>
        %69 = vector.extract_strided_slice %68 {offsets = [0, 0], sizes = [1, 1], strides = [1, 1]} : vector<1x128xf32> to vector<1x1xf32>
        %cst_39 = arith.constant 2.048000e+03 : f32
        %70 = vector.broadcast %cst_39 : f32 to vector<1x1xf32>
        %71 = arith.divf %69, %70 : vector<1x1xf32>
        %c4_40 = arith.constant 4 : index
        %c0_41 = arith.constant 0 : index
        %72 = vector.load %arg10[%c4_40, %c0_41] : memref<6x128xf32, #tpu.memory_space<vmem>>, vector<1x128xf32>
        %73 = vector.extract_strided_slice %72 {offsets = [0, 0], sizes = [1, 1], strides = [1, 1]} : vector<1x128xf32> to vector<1x1xf32>
        %cst_42 = arith.constant 2.048000e+03 : f32
        %74 = vector.broadcast %cst_42 : f32 to vector<1x1xf32>
        %75 = arith.divf %73, %74 : vector<1x1xf32>
        %76 = arith.mulf %71, %71 : vector<1x1xf32>
        %77 = arith.subf %75, %76 : vector<1x1xf32>
        %cst_43 = arith.constant 0.000000e+00 : f32
        %78 = vector.broadcast %cst_43 : f32 to vector<1x1xf32>
        %79 = arith.maximumf %77, %78 : vector<1x1xf32>
        %c5_44 = arith.constant 5 : index
        %c0_45 = arith.constant 0 : index
        %80 = vector.load %arg10[%c5_44, %c0_45] : memref<6x128xf32, #tpu.memory_space<vmem>>, vector<1x128xf32>
        %81 = vector.extract_strided_slice %80 {offsets = [0, 0], sizes = [1, 1], strides = [1, 1]} : vector<1x128xf32> to vector<1x1xf32>
        %82 = arith.addf %71, %81 : vector<1x1xf32>
        %cst_46 = arith.constant 9.99999974E-6 : f32
        %83 = vector.broadcast %cst_46 : f32 to vector<1x1xf32>
        %84 = arith.addf %79, %83 : vector<1x1xf32>
        %85 = math.rsqrt %84 : vector<1x1xf32>
        %c0_47 = arith.constant 0 : index
        %c0_48 = arith.constant 0 : index
        %86 = vector.load %arg7[%c0_47, %c0_48] : memref<8x2xf32, #tpu.memory_space<vmem>>, vector<8x2xf32>
        %87 = vector.extract_strided_slice %86 {offsets = [0, 0], sizes = [8, 1], strides = [1, 1]} : vector<8x2xf32> to vector<8x1xf32>
        %88 = vector.broadcast %85 : vector<1x1xf32> to vector<8x1xf32>
        %89 = arith.mulf %87, %88 : vector<8x1xf32>
        %90 = vector.extract_strided_slice %86 {offsets = [0, 1], sizes = [8, 1], strides = [1, 1]} : vector<8x2xf32> to vector<8x1xf32>
        %91 = vector.broadcast %82 : vector<1x1xf32> to vector<8x1xf32>
        %92 = arith.mulf %91, %89 : vector<8x1xf32>
        %93 = arith.subf %90, %92 : vector<8x1xf32>
        %c0_49 = arith.constant 0 : index
        %c0_50 = arith.constant 0 : index
        %c0_51 = arith.constant 0 : index
        %94 = vector.load %arg9[%c0_49, %c0_50, %c0_51] : memref<1x8x2xf32, #tpu.memory_space<vmem>>, vector<1x8x1xf32>
        %95 = vector.shape_cast %94 : vector<1x8x1xf32> to vector<8x1xf32>
        %96 = vector.shape_cast %89 : vector<8x1xf32> to vector<1x8x1xf32>
        tpu.vector_store %arg9[%c0_49, %c0_50, %c0_51], %96 {strides = array<i32>} : memref<1x8x2xf32, #tpu.memory_space<vmem>>, vector<1x8x1xf32>,
        %c0_52 = arith.constant 0 : index
        %c0_53 = arith.constant 0 : index
        %c1_54 = arith.constant 1 : index
        %97 = vector.load %arg9[%c0_52, %c0_53, %c1_54] : memref<1x8x2xf32, #tpu.memory_space<vmem>>, vector<1x8x1xf32>
        %98 = vector.shape_cast %97 : vector<1x8x1xf32> to vector<8x1xf32>
        %99 = vector.shape_cast %93 : vector<8x1xf32> to vector<1x8x1xf32>
        tpu.vector_store %arg9[%c0_52, %c0_53, %c1_54], %99 {strides = array<i32>} : memref<1x8x2xf32, #tpu.memory_space<vmem>>, vector<1x8x1xf32>,
      } else {
      }
    } else {
    }
    return
  }
  func.func @transform_0(%arg0: i32, %arg1: i32, %arg2: i32) -> (i32, i32, i32) {
    %c0_i32 = arith.constant 0 : i32
    %c0_i32_0 = arith.constant 0 : i32
    return %arg0, %c0_i32, %arg2 : i32, i32, i32
  }
  func.func @transform_1(%arg0: i32, %arg1: i32, %arg2: i32) -> (i32, i32) {
    %c0_i32 = arith.constant 0 : i32
    %c0_i32_0 = arith.constant 0 : i32
    %c0_i32_1 = arith.constant 0 : i32
    return %c0_i32, %c0_i32_0 : i32, i32
  }
  func.func @transform_2(%arg0: i32, %arg1: i32, %arg2: i32) -> (i32, i32) {
    %c0_i32 = arith.constant 0 : i32
    %c0_i32_0 = arith.constant 0 : i32
    %c0_i32_1 = arith.constant 0 : i32
    return %c0_i32, %c0_i32_0 : i32, i32
  }
  func.func @transform_3(%arg0: i32, %arg1: i32, %arg2: i32) -> (i32, i32) {
    %c0_i32 = arith.constant 0 : i32
    %c0_i32_0 = arith.constant 0 : i32
    %c0_i32_1 = arith.constant 0 : i32
    return %c0_i32, %c0_i32_0 : i32, i32
  }
  func.func @transform_4(%arg0: i32, %arg1: i32, %arg2: i32) -> (i32, i32) {
    %c0_i32 = arith.constant 0 : i32
    %c0_i32_0 = arith.constant 0 : i32
    %c0_i32_1 = arith.constant 0 : i32
    return %c0_i32, %c0_i32_0 : i32, i32
  }
  func.func @transform_5(%arg0: i32, %arg1: i32, %arg2: i32) -> (i32, i32, i32) {
    %0 = arith.muli %arg2, %arg1 : i32
    %c0_i32 = arith.constant 0 : i32
    %c0_i32_0 = arith.constant 0 : i32
    return %arg0, %c0_i32, %0 : i32, i32, i32
  }
  func.func @transform_6(%arg0: i32, %arg1: i32, %arg2: i32) -> (i32, i32, i32) {
    %c0_i32 = arith.constant 0 : i32
    %c0_i32_0 = arith.constant 0 : i32
    %c0_i32_1 = arith.constant 0 : i32
    return %arg0, %c0_i32, %c0_i32_0 : i32, i32, i32
  }
}

</mosaic_0001>

<bundles_post_ra>
// kernel: spatial_cgnlx.3
= control target key start
LH: loop header
LB: loop body
LE: loop exit
PB: predicated region body
PF: predicated region fallthrough
CT: control target
= control target key end

     0   :  { %s1174_s0 = inlined_call_operand.hbm [shape: f32[2,8,256], index: 0, kind: input, shape index: {}, may-alias: {0,3}]   ;;  %s1175_s1 = inlined_call_operand.hbm [shape: f32[2,8,256], index: 1, kind: input, shape index: {}]   ;;  %s1176_s2 = inlined_call_operand.hbm [shape: f32[2,8,2], index: 2, kind: input, shape index: {}]   ;;  %s1177_s3 = inlined_call_operand.hbm [shape: f32[2,8,256], index: 3, kind: output, shape index: {}, may-alias: {0,3}]  }
   0x1   :  { %1191 = sst [smem:[#allocation19_spill]] %s1175_s1 }
   0x2   :  { %8 = vsyncpa [#allocation3], 0 }
   0x3   :  { %10 = vsyncpa [#allocation3 + $0x1], 0 }
   0x4   :  { %11 = vsyncpa [#allocation6], 0 }
   0x5   :  { %13 = vsyncpa [#allocation6 + $0x1], 0 }
   0x6   :  { %14 = vsyncpa [#allocation4], 0 }
   0x7   :  { %16 = vsyncpa [#allocation4 + $0x1], 0  ;;  %s827_s12 = smov 0   ;;  %s829_s13 = smov 0  }
   0x8   :  { %s831_s14 = smov 0   ;;  %s833_s15 = smov 0  }
   0x9   :  { %s835_s16 = smov 0   ;;  %s837_s17 = smov 0  }
   0xa   :  { %s839_s18 = smov 0   ;;  %s841_s19 = smov 0  }
   0xb   :  { %s843_s20 = smov 0   ;;  %s845_s21 = smov 0  }
   0xc   :  { %s847_s22 = smov 0  }
   0xd LB: > { %1192 = sst [smem:[#allocation13_spill]] %s771_s15  ;;  %s883_s23 = sadd.s32 4294967295, %s799_s22   ;;  %s799_s22 = sphi %s847_s22, %s22_s22   ;;  %s795_s21 = sphi %s845_s21, %s1232_s21   ;;  %s791_s20 = sphi %s843_s20, %s1223_s20   ;;  %s787_s19 = sphi %s841_s19, %s1231_s19   ;;  %s783_s18 = sphi %s839_s18, %s1222_s18   ;;  %s779_s17 = sphi %s837_s17, %s1230_s17   ;;  %s775_s16 = sphi %s835_s16, %s1229_s16   ;;  %s771_s15 = sphi %s833_s15, %s1228_s15   ;;  %s767_s14 = sphi %s831_s14, %s1227_s14   ;;  %s763_s13 = sphi %s829_s13, %s1226_s13   ;;  %s759_s12 = sphi %s827_s12, %s1225_s12  }
   0xe   : > { %1193 = sst [smem:[#allocation14_spill]] %s791_s20  ;;  %s442_s24 = sadd.s32 4294967294, %s799_s22  }
   0xf   : > { %s31_s25 = sadd.s32 1, %s791_s20  ;;  %s34_s26 = sadd.s32 1, %s795_s21 }
  0x10   : > { %p32_p0 = scmp.ge.s32.totalorder %s31_s25, 2  ;;  %s43_s27 = sadd.s32 1, %s779_s17 }
  0x11   : > { %p50_p1 = scmp.ne.s32.totalorder %s779_s17, %s775_s16  ;;  %p1187_p2 = scmp.eq.s32.totalorder %s799_s22, 0 }
  0x12   : > { %s1234_s25 = smov (%p32_p0, %s31_s25), 0  ;;  %s1236_s26 = smov (!%p32_p0, %s34_s26), %s795_s21 }
  0x13   : > { %1194 = sst [smem:[#allocation15_spill]] %s1234_s25  ;;  %s39_s28 = ssub.s32 %s791_s20, %s1234_s25 }
  0x14   : > { %p899_p3 = por %p1187_p2, %p50_p1  ;;  %p36_p4 = scmp.ge.s32.totalorder %s1236_s26, 2 }
  0x15   : > { %p56_p5 = scmp.ne.s32.totalorder %s775_s16, %s771_s15  ;;  %p1186_p6 = scmp.eq.s32.totalorder %s883_s23, 0 }
  0x16   : > { %p136_p7 = scmp.eq.s32.totalorder %s883_s23, 3  ;;  %s1238_s26 = smov (%p36_p4, %s1236_s26), 0 }
  0x17   : > { %1196 = sst [smem:[#allocation16_spill]] %s1238_s26  ;;  %p911_p8 = por %p1186_p6, %p56_p5 }
  0x18   : > { %p915_p9 = por %p136_p7, %p50_p1  ;;  %s921_s5 = ssub.s32 %s795_s21, %s1238_s26 }
  0x19   : > { %s1197_s30 = scalar_select %p911_p8, 1, 0 }
  0x1a   : > { %s1198_s4 = scalar_select %p915_p9, 1, 0 }
  0x1b   : > { %p142_p10 = scmp.eq.s32.totalorder %s442_s24, 3  ;;  %s40_s6 = sor.u32 %s39_s28, %s921_s5 }
  0x1c   : > { %p41_p12 = scmp.eq.s32.totalorder %s40_s6, 0  ;;  %p1185_p0 = scmp.lt.s32.totalorder %s799_s22, 4 }
  0x1d   : > { %p925_p13 = por %p142_p10, %p56_p5  ;;  %s1180_s9 = sand.u32 1, %s779_s17  }
  0x1e   : > { %s931_s8 = scalar_select %p41_p12, %s779_s17, %s43_s27  }
  0x1f   : > { %s1199_s7 = scalar_select %p925_p13, 1, 0 }
  0x20   : > { %1201 = sst [smem:[#allocation18_spill]] %s931_s8  ;;  %s446_s10 = sshll.u32 %s795_s21, 1 }
  0x21   : > { %1200 = sst [smem:[#allocation17_spill]] %s1199_s7  ;;  %s937_s11 = sshll.u32 %s1180_s9, 3 }
  0x22   : > { %s940_s26 = sadd.s32 %s791_s20, %s446_s10  ;;  %p947_p1 = pnand %p1185_p0, %p899_p3 }
  0x23   : > { %s1182_s24 = sshll.u32 %s940_s26, 7  ;;  %s182_s27 = sand.u32 1, %s799_s22  }
  0x24   : > { %s1203_s1 = sld [smem:[#allocation19_spill]]  ;;  %s186_s10 = scalar_lea.vmem [#allocation5], %s937_s11 }
  0x25   : > { %s195_s29 = sshll.u32 %s186_s10, 4  ;;  %s963_s20 = scalar_lea.sflag [#allocation6], %s182_s27  ;;  %s960_s29 = int_to_ptr.vmem [resolvable:$true] %s195_s29 }
  0x26   : > { %p581_p5 = pneg %p947_p1 }
  0x2a   : > { %s957_s9 = scalar_lea.hbm %s1203_s1, %s1182_s24  ;;  %s584_s24 = scalar_lea.hbm %s1203_s1, 512 }
  0x2b   : > { %s579_s8 = scalar_lea.hbm %s957_s9, 128  ;;  %p585_p12 = scmp.lt.u32.totalorder %s957_s9, %s1203_s1 }
  0x2c   : > { %p580_p4 = scmp.ne.s32.totalorder %s957_s9, %s579_s8  ;;  %p586_p0 = scmp.lt.u32.totalorder %s584_s24, %s579_s8 }
  0x2d   : > { %p588_p2 = scmp.lt.u32.totalorder %s579_s8, %s957_s9 }
  0x2e   : > { %p582_p7 = pnand %p581_p5, %p580_p4  ;;  %p587_p6 = por %p586_p0, %p585_p12 }
  0x30   : > { %p583_p10 = pneg %p582_p7  ;;  %p589_p11 = por %p588_p2, %p587_p6 }
  0x32   : > { %p590_p3 = pnand %p589_p11, %p583_p10 }
  0x34   : > { %593 = shalt.err (!%p590_p3)
}
  0x35   : > { %s594_s27 = scalar_lea.vmem %s960_s29, 128  ;;  %s801_s10 = smov [#allocation5]  }
  0x36   : > { %p595_p4 = scmp.ne.s32.totalorder %s960_s29, %s594_s27  ;;  %s599_s25 = sshll.u32 %s801_s10, 4  ;;  %s600_s25 = int_to_ptr.vmem [resolvable:$false] %s599_s25 }
  0x37   : > { %s601_s15 = scalar_lea.vmem %s600_s25, 256  ;;  %p602_p9 = scmp.lt.s32.totalorder %s960_s29, %s600_s25 }
  0x38   : > { %p597_p7 = pnand %p595_p4, %p581_p5  ;;  %p603_p0 = scmp.lt.s32.totalorder %s601_s15, %s594_s27 }
  0x3a   : > { %p598_p13 = pneg %p597_p7  ;;  %p604_p12 = por %p603_p0, %p602_p9 }
  0x3c   : > { %p605_p2 = pnand %p604_p12, %p598_p13 }
  0x3e   : > { %608 = shalt.err (!%p605_p2)
}
  0x3f   : > { %477 = dma.hbm_to_vmem [thread:$0]  (!%p947_p1), %s957_s9, 128, %s960_s29, %s963_s20  }
  0x40   : > { %p218_p6 = scmp.lt.s32.totalorder %s799_s22, 5  ;;  %p1204_p11 = scmp.ge.s32.totalorder %s799_s22, 1 }
  0x41   : > { %s1206_s8 = sshll.u32 %s940_s26, 7  ;;  %s166_s10 = scalar_lea.vmem [#allocation2], %s937_s11 }
  0x42   : > { %p994_p3 = pnand %p1204_p11, %p218_p6  ;;  %s1003_s27 = scalar_lea.hbm %s1174_s0, %s1206_s8 }
  0x43   : > { %s175_s25 = sshll.u32 %s166_s10, 4  ;;  %s1207_s9 = sand.u32 1, %s779_s17   ;;  %s176_s25 = int_to_ptr.vmem [resolvable:$true] %s175_s25 }
  0x44   : > { %s1205_s7 = scalar_select %p994_p3, 1, 0 }
  0x45   : > { %s163_s29 = scalar_lea.sflag [#allocation3], %s1207_s9  ;;  %s609_s15 = scalar_lea.hbm %s1003_s27, 128 }
  0x46   : > { %p610_p9 = scmp.ne.s32.totalorder %s1003_s27, %s609_s15  ;;  %s614_s8 = scalar_lea.hbm %s1174_s0, 512 }
  0x47   : > { %p615_p4 = scmp.lt.u32.totalorder %s1003_s27, %s1174_s0  ;;  %p616_p7 = scmp.lt.u32.totalorder %s614_s8, %s609_s15 }
  0x48   : > { %p612_p13 = pnand %p610_p9, %p581_p5  ;;  %p618_p12 = scmp.lt.u32.totalorder %s609_s15, %s1003_s27 }
  0x49   : > { %p617_p0 = por %p616_p7, %p615_p4 }
  0x4a   : > { %p613_p10 = pneg %p612_p13 }
  0x4b   : > { %p619_p2 = por %p618_p12, %p617_p0 }
  0x4d   : > { %p620_p6 = pnand %p619_p2, %p613_p10 }
  0x4f   : > { %623 = shalt.err (!%p620_p6)
}
  0x50   : > { %s624_s11 = scalar_lea.vmem %s176_s25, 128  ;;  %s802_s10 = smov [#allocation2]  }
  0x51   : > { %p625_p11 = scmp.ne.s32.totalorder %s176_s25, %s624_s11  ;;  %s629_s1 = sshll.u32 %s802_s10, 4  ;;  %s630_s1 = int_to_ptr.vmem [resolvable:$false] %s629_s1 }
  0x52   : > { %s631_s9 = scalar_lea.vmem %s630_s1, 256  ;;  %p632_p8 = scmp.lt.s32.totalorder %s176_s25, %s630_s1 }
  0x53   : > { %p627_p9 = pnand %p625_p11, %p581_p5  ;;  %p633_p3 = scmp.lt.s32.totalorder %s631_s9, %s624_s11 }
  0x55   : > { %p628_p13 = pneg %p627_p9  ;;  %p634_p4 = por %p633_p3, %p632_p8 }
  0x57   : > { %p635_p7 = pnand %p634_p4, %p628_p13 }
  0x59   : > { %638 = shalt.err (!%p635_p7)
}
  0x5a   : > { %474 = dma.hbm_to_vmem [thread:$0]  (!%p947_p1), %s1003_s27, 128, %s176_s25, %s163_s29  }
  0x5b   : > { %s97_s15 = sadd.s32 1, %s767_s14  ;;  %p1208_p8 = scmp.eq.s32.totalorder %s921_s5, 0 }
  0x5c   : > { %p104_p5 = scmp.ne.s32.totalorder %s767_s14, %s763_s13  ;;  %p110_p3 = scmp.ne.s32.totalorder %s763_s13, %s759_s12 }
  0x5d   : > { %s1031_s26 = scalar_select %p1208_p8, %s767_s14, %s97_s15  }
  0x5e   : > { %s204_s28 = sand.u32 1, %s767_s14   ;;  %s452_s8 = sshll.u32 %s795_s21, 7 }
  0x5f   : > { %p1209_p10 = scmp.eq.s32.totalorder %s799_s22, 0  ;;  %p1210_p12 = scmp.eq.s32.totalorder %s883_s23, 0 }
  0x60   : > { %s451_s6 = sshll.u32 %s204_s28, 3  ;;  %s1050_s27 = scalar_lea.hbm %s1176_s2, %s452_s8 }
  0x61   : > { %p106_p0 = por %p104_p5, %p1209_p10  ;;  %p1043_p2 = por %p110_p3, %p1210_p12 }
  0x62   : > { %p1212_p1 = scmp.lt.s32.totalorder %s799_s22, 4  ;;  %s206_s5 = scalar_lea.vmem [#allocation7], %s451_s6 }
  0x63   : > { %s1211_s24 = scalar_select %p1043_p2, 1, 0 }
  0x64   : > { %p1054_p6 = pnand %p1212_p1, %p106_p0  ;;  %s213_s25 = sshll.u32 %s206_s5, 4  ;;  %s214_s25 = int_to_ptr.vmem [resolvable:$true] %s213_s25 }
  0x65   : > { %s639_s29 = scalar_lea.hbm %s1050_s27, 128  ;;  %s644_s15 = scalar_lea.hbm %s1176_s2, 256 }
  0x66   : > { %p640_p11 = scmp.ne.s32.totalorder %s1050_s27, %s639_s29  ;;  %p641_p9 = pneg %p1054_p6 }
  0x67   : > { %p645_p7 = scmp.lt.u32.totalorder %s1050_s27, %s1176_s2  ;;  %p646_p8 = scmp.lt.u32.totalorder %s644_s15, %s639_s29 }
  0x68   : > { %p642_p13 = pnand %p641_p9, %p640_p11  ;;  %p648_p3 = scmp.lt.u32.totalorder %s639_s29, %s1050_s27 }
  0x69   : > { %p647_p5 = por %p646_p8, %p645_p7 }
  0x6a   : > { %p643_p4 = pneg %p642_p13 }
  0x6b   : > { %p649_p10 = por %p648_p3, %p647_p5 }
  0x6d   : > { %p650_p0 = pnand %p649_p10, %p643_p4 }
  0x6f   : > { %653 = shalt.err (!%p650_p0)
}
  0x70   : > { %s654_s6 = scalar_lea.vmem %s214_s25, 128  ;;  %s803_s11 = smov [#allocation7]  }
  0x71   : > { %p655_p12 = scmp.ne.s32.totalorder %s214_s25, %s654_s6  ;;  %s659_s10 = sshll.u32 %s803_s11, 4  ;;  %s660_s10 = int_to_ptr.vmem [resolvable:$false] %s659_s10 }
  0x72   : > { %s661_s5 = scalar_lea.vmem %s660_s10, 256  ;;  %p662_p13 = scmp.lt.s32.totalorder %s214_s25, %s660_s10 }
  0x73   : > { %p657_p1 = pnand %p655_p12, %p641_p9  ;;  %p663_p2 = scmp.lt.s32.totalorder %s661_s5, %s654_s6 }
  0x75   : > { %p658_p11 = pneg %p657_p1  ;;  %p664_p7 = por %p663_p2, %p662_p13 }
  0x77   : > { %p665_p8 = pnand %p664_p7, %p658_p11 }
  0x79   : > { %668 = shalt.err (!%p665_p8)
}
  0x7a   : > { %480 = dma.hbm_to_vmem [thread:$0]  (!%p1054_p6), %s1050_s27, 128, %s214_s25, %s963_s20  }
  0x7b   : > { %p1214_p4 = scmp.ne.s32.totalorder %s1205_s7, 0 }
  0x7c   : > { %s1083_s29 = sand.u32 (!%p1214_p4), 1, %s775_s16   ;;  %p1215_p2 = scmp.ne.s32.totalorder (!%p1214_p4), %s1197_s30, 0 }
  0x7d   : > { %222 = sbr.rel (%p1214_p4) target bundleno = 293 (0x125), region = 32  ;;  %s1086_s1 = sshll.u32 (!%p1214_p4), %s1083_s29, 3 }
  0x7e   : > { %s225_s9 = scalar_lea.sflag (!%p1214_p4), [#allocation3], %s1083_s29  ;;  %s228_s15 = scalar_lea.vmem (!%p1214_p4), [#allocation2], %s1086_s1 }
  0x84   : > { %742 = dma.done.wait (%p1215_p2), %s225_s9, 128  }
  0x85   : > { %744 = vsyncadd (%p1215_p2), %s225_s9, 4294967168  ;;  %s233_s20 = sand.u32 1, %s883_s23   ;;  %s237_s27 = scalar_lea.vmem [#allocation5], %s1086_s1 }
  0x86   : > { %s234_s7 = scalar_lea.sflag [#allocation6], %s233_s20 }
  0x87   : > { %746 = dma.done.wait (%p1215_p2), %s234_s7, 128  }
  0x88   : > { %748 = vsyncadd (%p1215_p2), %s234_s7, 4294967168  ;;  %s244_s12 = sand.u32 1, %s763_s13   ;;  %p1216_p6 = scmp.ne.s32.totalorder %s1211_s24, 0 }
  0x89   : > { %s456_s25 = sshll.u32 %s244_s12, 3 }
  0x8a   : > { %s246_s28 = scalar_lea.vmem [#allocation7], %s456_s25 }
  0x8b   : > { %750 = dma.done.wait (%p1216_p6), %s234_s7, 128  }
  0x8c   : > { %752 = vsyncadd (%p1216_p6), %s234_s7, 4294967168  ;;  %v804_v0 = vmov 0   ;;  %v279_v1 = vld [vmem:[%s246_s28] sm:$0xff]  ;;  %v805_v2 = vmov 1   ;;  %s459_s23 = sshll.u32 %s787_s19, 1  ;;  %v292_v6 = vld [vmem:[%s237_s27] sm:$0xff] }
  0x8d   : > { %577 = vset.pattern.permute.xlu0 %v804_v0  ;;  %v280_v4 = vld [vmem:[%s228_s15] sm:$0xff]  ;;  %s307_s30 = sadd.s32 %s783_s18, %s459_s23  ;;  %s278_s8 = scalar_lea.vmem [#allocation8], %s1086_s1 }
  0x8e   : > { %283 = vperm.xlu0 %577, %v279_v1   ;;  %s460_s24 = sshll.u32 %s307_s30, 7  ;;  %s311_s6 = sshll.u32 %s278_s8, 4  ;;  %s1113_s6 = int_to_ptr.vmem [resolvable:$true] %s311_s6 }
  0x8f   : > { %s1111_s5 = scalar_lea.hbm %s1177_s3, %s460_s24  ;;  %s296_s18 = scalar_lea.sflag [#allocation4], %s1083_s29 }
  0x90   : > { %s669_s19 = scalar_lea.vmem %s1113_s6, 128  ;;  %p1217_p5 = scmp.ne.s32.totalorder %s1198_s4, 0 }
  0x91   : > { %p670_p9 = scmp.ne.s32.totalorder %s1113_s6, %s669_s19  ;;  %s806_s1 = smov [#allocation8]  }
  0x92   : > { %578 = vset.pattern.permute.xlu0 %v805_v2  ;;  %s673_s9 = sshll.u32 %s806_s1, 4  ;;  %s674_s9 = int_to_ptr.vmem [resolvable:$false] %s673_s9 }
  0x93   : > { %288 = vperm.xlu0 %578, %v279_v1   ;;  %p671_p3 = pnand %p670_p9, %p1217_p5  ;;  %s675_s15 = scalar_lea.vmem %s674_s9, 256 }
  0x94   : > { %p676_p0 = scmp.lt.s32.totalorder %s1113_s6, %s674_s9  ;;  %p677_p12 = scmp.lt.s32.totalorder %s675_s15, %s669_s19 }
  0x95   : > { %p672_p10 = pneg %p671_p3 }
  0x96   : > { %p678_p1 = por %p677_p12, %p676_p0 }
  0x98   : > { %p679_p11 = pnand %p678_p1, %p672_p10 }
 0x10d   : > { %v284_v3 = vpop.permute.xlu0 %283 }
 0x10e   : > { %v286_v5 = vmul.f32 %v284_v3, %v280_v4 }
 0x112   : > { %v289_v7 = vpop.permute.xlu0 %288 }
 0x113   : > { %v291_v8 = vadd.f32 %v289_v7, %v286_v5 }
 0x115   : > { %v293_v9 = vadd.f32 %v292_v6, %v291_v8 }
 0x117   : > { %294 = vst [vmem:[%s278_s8] sm:$0xff] %v293_v9 }
 0x118   : > { %682 = shalt.err (!%p679_p11)
}
 0x119   : > { %s683_s29 = scalar_lea.hbm %s1111_s5, 128  ;;  %s687_s27 = scalar_lea.hbm %s1177_s3, 512 }
 0x11a   : > { %p684_p13 = scmp.ne.s32.totalorder %s1111_s5, %s683_s29  ;;  %p688_p4 = scmp.lt.u32.totalorder %s1111_s5, %s1177_s3 }
 0x11b   : > { %p689_p2 = scmp.lt.u32.totalorder %s687_s27, %s683_s29  ;;  %p691_p9 = scmp.lt.u32.totalorder %s683_s29, %s1111_s5 }
 0x11c   : > { %p685_p7 = pnand %p684_p13, %p1217_p5 }
 0x11d   : > { %p690_p6 = por %p689_p2, %p688_p4 }
 0x11e   : > { %p686_p8 = pneg %p685_p7 }
 0x11f   : > { %p692_p3 = por %p691_p9, %p690_p6 }
 0x121   : > { %p693_p10 = pnand %p692_p3, %p686_p8 }
 0x123   : > { %696 = shalt.err (!%p693_p10)
}
 0x124   : > { %469 = dma.vmem_to_hbm [thread:$0]  (%p1217_p5), %s1113_s6, 128, %s1111_s5, %s296_s18  }
 0x125 PF: > { %s1218_s28 = sld [smem:[#allocation13_spill]]  ;;  %s1219_s23 = sld [smem:[#allocation17_spill]] }
 0x126   : > { %p486_p0 = scmp.ge.s32.totalorder %s799_s22, 2 }
 0x12b   : > { %s323_s30 = sand.u32 1, %s1218_s28   ;;  %p1220_p12 = scmp.ne.s32.totalorder %s1219_s23, 0 }
 0x12c   : > { %s324_s24 = scalar_lea.sflag [#allocation4], %s323_s30 }
 0x12d   : > { %p482_p1 = pnand %p486_p0, %p1220_p12 }
 0x12f   : > { %754 = dma.done.wait (!%p482_p1), %s324_s24, 128  }
 0x130   : > { %756 = vsyncadd (!%p482_p1), %s324_s24, 4294967168  ;;  %s22_s22 = sadd.s32 1, %s799_s22   ;;  %s1221_s4 = sld [smem:[#allocation18_spill]] }
 0x131   : > { %p19_p11 = scmp.ge.s32.totalorder %s22_s22, 6   ;;  %s1222_s18 = sld [smem:[#allocation14_spill]] }
 0x132   : > { %s1223_s20 = sld [smem:[#allocation15_spill]]  ;;  %s1224_s8 = sld [smem:[#allocation16_spill]] }
 0x133   : > { %s1225_s12 = smov %s763_s13  ;;  %s1226_s13 = smov %s767_s14 }
 0x134   : > { %s1227_s14 = smov %s1031_s26  ;;  %s1228_s15 = smov %s775_s16 }
 0x135   : > { %s1229_s16 = smov %s779_s17  ;;  %s1231_s19 = smov %s795_s21 }
 0x136   : > { %s1230_s17 = smov %s1221_s4  ;;  %21 = sbr.rel (!%p19_p11) target bundleno = 13 (0xd), region = 101 }
 0x138   : > { %s1232_s21 = smov %s1224_s8 }
 0x13d   :  { %329 = vsyncpa [#allocation3], 1 }
 0x13e   :  { %331 = vsyncpa [#allocation3 + $0x1], 1 }
 0x13f   :  { %332 = vsyncpa [#allocation6], 1 }
 0x140   :  { %334 = vsyncpa [#allocation6 + $0x1], 1 }
 0x141   :  { %335 = vsyncpa [#allocation4], 1 }
 0x142   :  { %337 = vsyncpa [#allocation4 + $0x1], 1 }

// kernel: spatial_cgnlx.2
= control target key start
LH: loop header
LB: loop body
LE: loop exit
PB: predicated region body
PF: predicated region fallthrough
CT: control target
= control target key end

     0   :  { %s2011_s0 = inlined_call_operand.hbm [shape: f32[2,8,256], index: 0, kind: input, shape index: {}]   ;;  %s2012_s1 = inlined_call_operand.hbm [shape: bf16[16,8], index: 1, kind: input, shape index: {}]   ;;  %s2013_s2 = inlined_call_operand.hbm [shape: bf16[8,8], index: 2, kind: input, shape index: {}]   ;;  %s2014_s3 = inlined_call_operand.hbm [shape: bf16[8,8], index: 3, kind: input, shape index: {}]   ;;  %s2015_s4 = inlined_call_operand.hbm [shape: f32[8,2], index: 4, kind: input, shape index: {}]   ;;  %s2016_s5 = inlined_call_operand.hbm [shape: f32[2,8,256], index: 5, kind: output, shape index: {0}]   ;;  %s2017_s6 = inlined_call_operand.hbm [shape: f32[2,8,2], index: 6, kind: output, shape index: {1}]  }
   0x1   :  { %2044 = sst [smem:[#allocation36_spill]] %s2011_s0 }
   0x2   :  { %2045 = sst [smem:[#allocation37_spill]] %s2012_s1 }
   0x3   :  { %2046 = sst [smem:[#allocation38_spill]] %s2013_s2 }
   0x4   :  { %2047 = sst [smem:[#allocation39_spill]] %s2014_s3 }
   0x5   :  { %2048 = sst [smem:[#allocation40_spill]] %s2015_s4 }
   0x6   :  { %2049 = sst [smem:[#allocation41_spill]] %s2016_s5 }
   0x7   :  { %2050 = sst [smem:[#allocation42_spill]] %s2017_s6 }
   0x8   :  { %12 = vsyncpa [#allocation4], 0 }
   0x9   :  { %14 = vsyncpa [#allocation4 + $0x1], 0 }
   0xa   :  { %15 = vsyncpa [#allocation7], 0 }
   0xb   :  { %16 = vsyncpa [#allocation10], 0 }
   0xc   :  { %17 = vsyncpa [#allocation5], 0 }
   0xd   :  { %19 = vsyncpa [#allocation5 + $0x1], 0 }
   0xe   :  { %20 = vsyncpa [#allocation14], 0 }
   0xf   :  { %22 = vsyncpa [#allocation14 + $0x1], 0  ;;  %s1527_s21 = smov 0   ;;  %s1529_s22 = smov 0  }
  0x10   :  { %s1531_s23 = smov 0   ;;  %s1533_s24 = smov 0  }
  0x11   :  { %s1535_s25 = smov 0   ;;  %s1537_s26 = smov 0  }
  0x12   :  { %s1539_s27 = smov 0   ;;  %s1541_s28 = smov 0  }
  0x13   :  { %s1543_s29 = smov 0   ;;  %s1545_s30 = smov 0  }
  0x14   :  { %s1547_s7 = smov 0   ;;  %s1549_s8 = smov 0  }
  0x15   :  { %s1551_s9 = smov 0   ;;  %s1553_s10 = smov 0  }
  0x16   :  { %s1555_s11 = smov 0   ;;  %s1557_s12 = smov 0  }
  0x17 LB: > { %2051 = sst [smem:[#allocation20_spill]] %s1415_s21  ;;  %s866_s13 = sadd.s32 4294967295, %s1475_s12   ;;  %s1475_s12 = sphi %s1557_s12, %s28_s12   ;;  %s1471_s11 = sphi %s1555_s11, %s2119_s11   ;;  %s1467_s10 = sphi %s1553_s10, %s2131_s10   ;;  %s1463_s9 = sphi %s1551_s9, %s2130_s9   ;;  %s1459_s8 = sphi %s1549_s8, %s2116_s8   ;;  %s1455_s7 = sphi %s1547_s7, %s2129_s7   ;;  %s1451_s30 = sphi %s1545_s30, %s2128_s30   ;;  %s1447_s29 = sphi %s1543_s29, %s2127_s29   ;;  %s1443_s28 = sphi %s1541_s28, %s2126_s28   ;;  %s1439_s27 = sphi %s1539_s27, %s2125_s27   ;;  %s1435_s26 = sphi %s1537_s26, %s2124_s26   ;;  %s1431_s25 = sphi %s1535_s25, %s2123_s25   ;;  %s1427_s24 = sphi %s1533_s24, %s2115_s24   ;;  %s1423_s23 = sphi %s1531_s23, %s2122_s23   ;;  %s1419_s22 = sphi %s1529_s22, %s2121_s22   ;;  %s1415_s21 = sphi %s1527_s21, %s2114_s21  }
  0x18   : > { %2052 = sst [smem:[#allocation21_spill]] %s1419_s22  ;;  %s867_s14 = sadd.s32 4294967294, %s1475_s12  }
  0x19   : > { %2053 = sst [smem:[#allocation22_spill]] %s1427_s24  ;;  %p1609_p0 = scmp.eq.s32.totalorder %s866_s13, 0 }
  0x1a   : > { %2054 = sst [smem:[#allocation23_spill]] %s1431_s25  ;;  %p180_p1 = scmp.ne.s32.totalorder %s1435_s26, %s1431_s25 }
  0x1b   : > { %2055 = sst [smem:[#allocation24_spill]] %s1451_s30  ;;  %p181_p2 = scmp.eq.s32.totalorder %s866_s13, 7 }
  0x1c   : > { %2056 = sst [smem:[#allocation25_spill]] %s1455_s7  ;;  %p186_p3 = scmp.ne.s32.totalorder %s1431_s25, %s1427_s24 }
  0x1d   : > { %2057 = sst [smem:[#allocation26_spill]] %s1459_s8  ;;  %p187_p4 = scmp.eq.s32.totalorder %s867_s14, 7 }
  0x1e   : > { %2058 = sst [smem:[#allocation27_spill]] %s1471_s11  ;;  %p206_p5 = scmp.ne.s32.totalorder %s1423_s23, %s1419_s22 }
  0x1f   : > { %s2059_s15 = scalar_select %p1609_p0, 1, 0 }
  0x20   : > { %p1619_p6 = por %p181_p2, %p180_p1  ;;  %p212_p7 = scmp.ne.s32.totalorder %s1419_s22, %s1415_s21 }
  0x21   : > { %p1625_p8 = por %p187_p4, %p186_p3  ;;  %p1629_p9 = por %p206_p5, %p181_p2 }
  0x22   : > { %s2060_s16 = scalar_select %p1619_p6, 1, 0 }
  0x23   : > { %s2062_s17 = scalar_select %p1625_p8, 1, 0 }
  0x24   : > { %2061 = sst [smem:[#allocation28_spill]] %s2060_s16  ;;  %p1633_p10 = por %p212_p7, %p187_p4 }
  0x25   : > { %2063 = sst [smem:[#allocation29_spill]] %s2062_s17  ;;  %p868_p11 = scmp.ge.s32.totalorder %s1475_s12, 1 }
  0x26   : > { %s2064_s18 = scalar_select %p1629_p9, 1, 0 }
  0x27   : > { %s2066_s19 = scalar_select %p1633_p10, 1, 0 }
  0x28   : > { %2065 = sst [smem:[#allocation30_spill]] %s2064_s18  ;;  %p220_p12 = scmp.lt.s32.totalorder %s1475_s12, 9 }
  0x29   : > { %2067 = sst [smem:[#allocation31_spill]] %s2066_s19  ;;  %s1477_s13 = smov [#allocation6]  }
  0x2a   : > { %p1639_p13 = pnand %p868_p11, %p220_p12  ;;  %s232_s14 = sshll.u32 %s1477_s13, 4  ;;  %s1643_s14 = int_to_ptr.vmem [resolvable:$true] %s232_s14 }
  0x2b   : > { %s1478_s19 = smov [#allocation9]   ;;  %s1479_s24 = smov [#allocation8]  }
  0x2c   : > { %s2068_s20 = scalar_select %p1639_p13, 1, 0 }
  0x2d   : > { %p954_p1 = pneg %p1639_p13  ;;  %s257_s17 = sshll.u32 %s1478_s19, 4  ;;  %s1653_s17 = int_to_ptr.vmem [resolvable:$true] %s257_s17 }
  0x2e   : > { %2069 = sst [smem:[#allocation32_spill]] %s2068_s20  ;;  %s246_s6 = sshll.u32 %s1479_s24, 4  ;;  %s1655_s6 = int_to_ptr.vmem [resolvable:$true] %s246_s6 }
  0x2f   : > { %p1649_p2 = pnand %p954_p1, %p1609_p0  ;;  %s2071_s1 = sld [smem:[#allocation37_spill]] }
  0x31   : > { %p1665_p4 = pneg %p1649_p2 }
  0x35   : > { %s1131_s5 = scalar_lea.hbm %s2071_s1, 128 }
  0x36   : > { %p1132_p3 = scmp.ne.s32.totalorder %s2071_s1, %s1131_s5  ;;  %p1138_p11 = scmp.lt.u32.totalorder %s1131_s5, %s2071_s1 }
  0x38   : > { %p1134_p5 = pnand %p1665_p4, %p1132_p3 }
  0x3a   : > { %p1135_p7 = pneg %p1134_p5 }
  0x3c   : > { %p1140_p12 = pnand %p1138_p11, %p1135_p7 }
  0x3e   : > { %1143 = shalt.err (!%p1140_p12)
}
  0x3f   : > { %s1144_s8 = scalar_lea.vmem %s1643_s14, 128  ;;  %p1152_p9 = scmp.lt.s32.totalorder %s1643_s14, %s1643_s14 }
  0x40   : > { %p1145_p1 = scmp.ne.s32.totalorder %s1643_s14, %s1144_s8  ;;  %p1153_p6 = scmp.lt.s32.totalorder %s1144_s8, %s1144_s8 }
  0x42   : > { %p1147_p10 = pnand %p1145_p1, %p1665_p4  ;;  %p1154_p3 = por %p1153_p6, %p1152_p9 }
  0x44   : > { %p1148_p8 = pneg %p1147_p10 }
  0x46   : > { %p1155_p5 = pnand %p1154_p3, %p1148_p8 }
  0x48   : > { %1158 = shalt.err (!%p1155_p5)
}
  0x49   : > { %s1480_s16 = smov 64   ;;  %s1481_s5 = smov 4  }
  0x4a   : > { %957 = dma.hbm_to_vmem [thread:$0]  (!%p1649_p2), %s2071_s1, 128, %s1643_s14, [#allocation7], %s1480_s16, %s1480_s16, %s1481_s5  }
  0x4b   : > { %s2073_s3 = sld [smem:[#allocation39_spill]] }
  0x51   : > { %s1159_s7 = scalar_lea.hbm %s2073_s3, 64 }
  0x52   : > { %p1160_p6 = scmp.ne.s32.totalorder %s2073_s3, %s1159_s7  ;;  %p1166_p10 = scmp.lt.u32.totalorder %s1159_s7, %s2073_s3 }
  0x54   : > { %p1162_p8 = pnand %p1160_p6, %p1665_p4 }
  0x56   : > { %p1163_p9 = pneg %p1162_p8 }
  0x58   : > { %p1168_p7 = pnand %p1166_p10, %p1163_p9 }
  0x5a   : > { %1171 = shalt.err (!%p1168_p7)
}
  0x5b   : > { %s1172_s14 = scalar_lea.vmem %s1653_s17, 64  ;;  %p1180_p3 = scmp.lt.s32.totalorder %s1653_s17, %s1653_s17 }
  0x5c   : > { %p1173_p11 = scmp.ne.s32.totalorder %s1653_s17, %s1172_s14  ;;  %p1181_p5 = scmp.lt.s32.totalorder %s1172_s14, %s1172_s14 }
  0x5e   : > { %p1175_p12 = pnand %p1173_p11, %p1665_p4  ;;  %p1182_p6 = por %p1181_p5, %p1180_p3 }
  0x60   : > { %p1176_p1 = pneg %p1175_p12 }
  0x62   : > { %p1183_p8 = pnand %p1182_p6, %p1176_p1 }
  0x64   : > { %1186 = shalt.err (!%p1183_p8)
}
  0x65   : > { %963 = dma.hbm_to_vmem [thread:$0]  (!%p1649_p2), %s2073_s3, 64, %s1653_s17, [#allocation10]  }
  0x66   : > { %s2074_s2 = sld [smem:[#allocation38_spill]] }
  0x6c   : > { %s1187_s16 = scalar_lea.hbm %s2074_s2, 64 }
  0x6d   : > { %p1188_p9 = scmp.ne.s32.totalorder %s2074_s2, %s1187_s16  ;;  %p1194_p11 = scmp.lt.u32.totalorder %s1187_s16, %s2074_s2 }
  0x6f   : > { %p1190_p10 = pnand %p1188_p9, %p1665_p4 }
  0x71   : > { %p1191_p7 = pneg %p1190_p10 }
  0x73   : > { %p1196_p12 = pnand %p1194_p11, %p1191_p7 }
  0x75   : > { %1199 = shalt.err (!%p1196_p12)
}
  0x76   : > { %s1200_s17 = scalar_lea.vmem %s1655_s6, 64  ;;  %p1208_p6 = scmp.lt.s32.totalorder %s1655_s6, %s1655_s6 }
  0x77   : > { %p1201_p1 = scmp.ne.s32.totalorder %s1655_s6, %s1200_s17  ;;  %p1209_p8 = scmp.lt.s32.totalorder %s1200_s17, %s1200_s17 }
  0x79   : > { %p1203_p3 = pnand %p1201_p1, %p1665_p4  ;;  %p1210_p9 = por %p1209_p8, %p1208_p6 }
  0x7b   : > { %p1204_p5 = pneg %p1203_p3 }
  0x7d   : > { %p1211_p10 = pnand %p1210_p9, %p1204_p5 }
  0x7f   : > { %1214 = shalt.err (!%p1211_p10)
}
  0x80   : > { %960 = dma.hbm_to_vmem [thread:$0]  (!%p1649_p2), %s2074_s2, 64, %s1655_s6, [#allocation7]  }
  0x81   : > { %s1482_s14 = smov [#allocation11]   ;;  %s2075_s4 = sld [smem:[#allocation40_spill]] }
  0x82   : > { %s268_s22 = sshll.u32 %s1482_s14, 4  ;;  %s269_s22 = int_to_ptr.vmem [resolvable:$true] %s268_s22 }
  0x87   : > { %s1215_s20 = scalar_lea.hbm %s2075_s4, 128 }
  0x88   : > { %p1216_p7 = scmp.ne.s32.totalorder %s2075_s4, %s1215_s20  ;;  %p1222_p1 = scmp.lt.u32.totalorder %s1215_s20, %s2075_s4 }
  0x8a   : > { %p1218_p11 = pnand %p1216_p7, %p1665_p4 }
  0x8c   : > { %p1219_p12 = pneg %p1218_p11 }
  0x8e   : > { %p1224_p3 = pnand %p1222_p1, %p1219_p12 }
  0x90   : > { %1227 = shalt.err (!%p1224_p3)
}
  0x91   : > { %s1228_s6 = scalar_lea.vmem %s269_s22, 128  ;;  %p1236_p9 = scmp.lt.s32.totalorder %s269_s22, %s269_s22 }
  0x92   : > { %p1229_p5 = scmp.ne.s32.totalorder %s269_s22, %s1228_s6  ;;  %p1237_p10 = scmp.lt.s32.totalorder %s1228_s6, %s1228_s6 }
  0x94   : > { %p1231_p6 = pnand %p1229_p5, %p1665_p4  ;;  %p1238_p13 = por %p1237_p10, %p1236_p9 }
  0x96   : > { %p1232_p8 = pneg %p1231_p6 }
  0x98   : > { %p1239_p0 = pnand %p1238_p13, %p1232_p8 }
  0x9a   : > { %1242 = shalt.err (!%p1239_p0)
}
  0x9b   : > { %966 = dma.hbm_to_vmem [thread:$0]  (!%p1649_p2), %s2075_s4, 128, %s269_s22, [#allocation10]  }
  0x9c   : > { %s40_s21 = sadd.s32 1, %s1463_s9  ;;  %s43_s30 = sadd.s32 1, %s1467_s10 }
  0x9d   : > { %p41_p0 = scmp.ge.s32.totalorder %s40_s21, 2  ;;  %s47_s19 = sadd.s32 1, %s1471_s11 }
  0x9e   : > { %s56_s14 = sadd.s32 1, %s1447_s29  ;;  %p63_p4 = scmp.ne.s32.totalorder %s1447_s29, %s1443_s28 }
  0x9f   : > { %s2133_s21 = smov (%p41_p0, %s40_s21), 0  ;;  %s2135_s30 = smov (!%p41_p0, %s43_s30), %s1467_s10 }
  0xa0   : > { %2076 = sst [smem:[#allocation33_spill]] %s2133_s21  ;;  %s52_s8 = ssub.s32 %s1463_s9, %s2133_s21 }
  0xa1   : > { %p45_p13 = scmp.ge.s32.totalorder %s2135_s30, 2  ;;  %p64_p2 = scmp.eq.s32.totalorder %s1475_s12, 0 }
  0xa2   : > { %p69_p7 = scmp.ne.s32.totalorder %s1443_s28, %s1439_s27  ;;  %p2078_p11 = scmp.ne.s32.totalorder %s2059_s15, 0 }
  0xa3   : > { %s2137_s30 = smov (%p45_p13, %s2135_s30), 0  ;;  %s2139_s19 = smov (!%p45_p13, %s47_s19), %s1471_s11 }
  0xa4   : > { %2077 = sst [smem:[#allocation34_spill]] %s2137_s30  ;;  %p1769_p12 = por %p2078_p11, %p69_p7 }
  0xa5   : > { %s163_s25 = smul.u32 %s1463_s9, %s1467_s10  ;;  %p49_p1 = scmp.ge.s32.totalorder %s2139_s19, 2 }
  0xa6   : > { %s164_s7 = smul.u32 %s2137_s30, %s2133_s21  ;;  %p1777_p3 = por %p64_p2, %p63_p4 }
  0xa7   : > { %s170_s27 = sadd.s32 1, %s1435_s26  ;;  %s2141_s19 = smov (%p49_p1, %s2139_s19), 0 }
  0xa8   : > { %2081 = sst [smem:[#allocation35_spill]] %s2141_s19  ;;  %s166_s16 = ssub.s32 %s163_s25, %s164_s7 }
  0xa9   : > { %s196_s5 = sadd.s32 1, %s1423_s23  ;;  %s51_s18 = ssub.s32 %s1471_s11, %s2141_s19 }
  0xaa   : > { %p982_p5 = scmp.lt.s32.totalorder %s1475_s12, 8  ;;  %s53_s13 = sor.u32 %s52_s8, %s51_s18 }
  0xab   : > { %s167_s6 = sor.u32 %s166_s16, %s51_s18  ;;  %p54_p6 = scmp.eq.s32.totalorder %s53_s13, 0 }
  0xac   : > { %p168_p8 = scmp.eq.s32.totalorder %s167_s6, 0  ;;  %p194_p9 = scmp.eq.s32.totalorder %s51_s18, 0 }
  0xad   : > { %s279_s24 = sand.u32 1, %s1447_s29   ;;  %s875_s4 = sshll.u32 %s1471_s11, 1 }
  0xae   : > { %s1790_s17 = scalar_select %p54_p6, %s1447_s29, %s56_s14  }
  0xaf   : > { %s1793_s1 = scalar_select %p168_p8, %s1435_s26, %s170_s27  }
  0xb0   : > { %s1796_s2 = scalar_select %p194_p9, %s1423_s23, %s196_s5  }
  0xb1   : > { %s874_s3 = sshll.u32 %s279_s24, 3  ;;  %s288_s25 = sadd.s32 %s1463_s9, %s875_s4 }
  0xb2   : > { %s876_s7 = sshll.u32 %s288_s25, 7  ;;  %s283_s19 = scalar_lea.vmem [#allocation3], %s874_s3 }
  0xb3   : > { %s292_s30 = sshll.u32 %s283_s19, 4  ;;  %s2082_s0 = sld [smem:[#allocation36_spill]]  ;;  %s1805_s30 = int_to_ptr.vmem [resolvable:$true] %s292_s30 }
  0xb4   : > { %p1811_p10 = pnand %p982_p5, %p1777_p3  ;;  %s280_s3 = scalar_lea.sflag [#allocation4], %s279_s24 }
  0xb6   : > { %p1245_p13 = pneg %p1811_p10 }
  0xb9   : > { %s1803_s21 = scalar_lea.hbm %s2082_s0, %s876_s7  ;;  %s1248_s20 = scalar_lea.hbm %s2082_s0, 512 }
  0xba   : > { %s1243_s4 = scalar_lea.hbm %s1803_s21, 128  ;;  %p1249_p7 = scmp.lt.u32.totalorder %s1803_s21, %s2082_s0 }
  0xbb   : > { %p1244_p0 = scmp.ne.s32.totalorder %s1803_s21, %s1243_s4  ;;  %p1250_p11 = scmp.lt.u32.totalorder %s1248_s20, %s1243_s4 }
  0xbc   : > { %p1252_p3 = scmp.lt.u32.totalorder %s1243_s4, %s1803_s21 }
  0xbd   : > { %p1246_p4 = pnand %p1245_p13, %p1244_p0  ;;  %p1251_p1 = por %p1250_p11, %p1249_p7 }
  0xbf   : > { %p1247_p2 = pneg %p1246_p4  ;;  %p1253_p5 = por %p1252_p3, %p1251_p1 }
  0xc1   : > { %p1254_p6 = pnand %p1253_p5, %p1247_p2 }
  0xc3   : > { %1257 = shalt.err (!%p1254_p6)
}
  0xc4   : > { %s1258_s13 = scalar_lea.vmem %s1805_s30, 128  ;;  %s1483_s6 = smov [#allocation3]  }
  0xc5   : > { %p1259_p8 = scmp.ne.s32.totalorder %s1805_s30, %s1258_s13  ;;  %s1263_s24 = sshll.u32 %s1483_s6, 4  ;;  %s1264_s24 = int_to_ptr.vmem [resolvable:$false] %s1263_s24 }
  0xc6   : > { %s1265_s25 = scalar_lea.vmem %s1264_s24, 256  ;;  %p1266_p4 = scmp.lt.s32.totalorder %s1805_s30, %s1264_s24 }
  0xc7   : > { %p1261_p9 = pnand %p1259_p8, %p1245_p13  ;;  %p1267_p7 = scmp.lt.s32.totalorder %s1265_s25, %s1258_s13 }
  0xc9   : > { %p1262_p0 = pneg %p1261_p9  ;;  %p1268_p11 = por %p1267_p7, %p1266_p4 }
  0xcb   : > { %p1269_p1 = pnand %p1268_p11, %p1262_p0 }
  0xcd   : > { %1272 = shalt.err (!%p1269_p1)
}
  0xce   : > { %970 = dma.hbm_to_vmem [thread:$0]  (!%p1811_p10), %s1803_s21, 128, %s1805_s30, %s280_s3  }
  0xcf   : > { %s2084_s7 = sld [smem:[#allocation32_spill]] }
  0xd5   : > { %p2085_p2 = scmp.ne.s32.totalorder %s2084_s7, 0 }
  0xd6   : > { %s303_s8 = sand.u32 (!%p2085_p2), 1, %s1443_s28  }
  0xd7   : > { %301 = sbr.rel (%p2085_p2) target bundleno = 1674 (0x68a), region = 40  ;;  %s1843_s16 = sshll.u32 (!%p2085_p2), %s303_s8, 3 }
  0xd8   : > { %s304_s4 = scalar_lea.sflag (!%p2085_p2), [#allocation4], %s303_s8  ;;  %s307_s19 = scalar_lea.vmem (!%p2085_p2), [#allocation3], %s1843_s16 }
  0xde   : > { %1394 = dma.done.wait (%p1769_p12), %s304_s4, 128  }
  0xdf   : > { %1396 = vsyncadd (%p1769_p12), %s304_s4, 4294967168  ;;  %p2086_p13 = scmp.ne.s32.totalorder %s2059_s15, 0 }
  0xe1   : > { %1398 = dma.done.wait (%p2086_p13), [#allocation7], 192  }
  0xe2   : > { %1400 = vsyncadd (%p2086_p13), [#allocation7], 4294967104 }
  0xe3   : > { %1402 = dma.done.wait (%p2086_p13), [#allocation10], 192  }
  0xe4   : > { %1404 = vsyncadd (%p2086_p13), [#allocation10], 4294967104  ;;  %s2087_s21 = sld [smem:[#allocation23_spill]]  ;;  %s2088_s30 = sld [smem:[#allocation21_spill]] }
  0xe5   : > { %s2089_s14 = sld [smem:[#allocation25_spill]]  ;;  %s2090_s3 = sld [smem:[#allocation24_spill]] }
  0xea   : > { %s347_s22 = sand.u32 1, %s2087_s21   ;;  %s2042_s27 = sand.u32 1, %s2088_s30  }
  0xeb   : > { %s1862_s20 = sshll.u32 %s347_s22, 3  ;;  %s884_s5 = sshll.u32 %s2042_s27, 3 }
  0xec   : > { %p359_p12 = scmp.eq.s32.totalorder %s2089_s14, 0  ;;  %p360_p10 = scmp.eq.s32.totalorder %s2090_s3, 0 }
  0xed   : > { %s349_s18 = scalar_lea.vmem [#allocation12], %s1862_s20  ;;  %s1869_s15 = scalar_lea.vmem [#allocation13], %s884_s5 }
  0xee   : > { %p361_p3 = pnand %p360_p10, %p359_p12 }
  0xef   : > { %v1484_v0 = vmov (!%p361_p3), 0.0  }
  0xf0   : > { %364 = sbr.rel (%p361_p3) target bundleno = 247 (0xf7), region = 64  ;;  %365 = vst [vmem:[#allocation2] sm:$0x3f] (!%p361_p3), %v1484_v0 }
  0xf7 PF: > { %s2091_s13 = sld [smem:[#allocation25_spill]] }
  0xfd   : > { %p885_p5 = scmp.ne.s32.totalorder %s2091_s13, 0 }
  0xfe   : > { %v369_v1 = vld [vmem:[%s307_s19] sm:$0xff] (!%p885_p5)  ;;  %vm382_vm0 = vcmask (!%p885_p5), 1043456   ;;  %v1485_v2 = vmov (!%p885_p5), 0.0   ;;  %vm1486_vm1 = vmmov (!%p885_p5), 0   ;;  %v1128_v5 = vld [vmem:[#allocation6] sm:$0xff] (!%p885_p5)   ;;  %vm378_vm2 = vcmask (!%p885_p5), 64512  }
  0xff   : > { %368 = sbr.rel (%p885_p5) target bundleno = 638 (0x27e), region = 68  ;;  %906 = vmatprep.subr.bf16.mxu0 (!%p885_p5), %v1485_v2  ;;  %v370_v3 = vpack.c.bf16 (!%p885_p5), %v369_v1, %v369_v1  ;;  %908 = vmatprep.mubr.msk.bf16.mxu0 (!%p885_p5), %vm1486_vm1, %v1485_v2  ;;  %v427_v29 = vld [vmem:[#allocation2] sm:$0x1] (!%p885_p5)  ;;  %v440_v36 = vld [vmem:[#allocation2 + $0x1] sm:$0x1] (!%p885_p5) }
 0x100   : > { %v453_v37 = vld [vmem:[#allocation2 + $0x2] sm:$0x1] (!%p885_p5) }
 0x101   : > { %v384_v4 = vsel (!%p885_p5), %vm382_vm0, %v370_v3, 0 }
 0x102   : > { %907 = vmatpush3.bf16.msra.mxu0 (!%p885_p5), %v384_v4 }
 0x105   : > { %909 = vmatmul.mubr.msk.bf16.vlgmr.msra.gmra.mrb[0].mxu0 (!%p885_p5), %vm378_vm2, %v1128_v5 }
 0x1d8   : > { %v420_v6 = vpop.f32.mrb[0].mxu0 }
 0x1d9   : > { %v910_v7 = vpop.f32.mrb[1].mxu0 }
 0x1da   : > { %v423_v8 = vpop.f32.mrb[2].mxu0 }
 0x1db   : > { %428 = vadd.xlane.f32.xlu0 %v423_v8  ;;  %v911_v9 = vpop.f32.mrb[3].mxu0  ;;  %v439_v10 = vmul.f32 %v423_v8, %v420_v6 }
 0x1dd   : > { %v452_v11 = vmul.f32 %v439_v10, %v420_v6 }
 0x1df   : > { %441 = vadd.xlane.f32.xlu0 %v439_v10  ;;  %454 = vadd.xlane.f32.xlu1 %v452_v11 }
 0x268   : > { %v429_v12 = vpop.xlane.xlu0 %428 }
 0x269   : > { %v430_v13 = vrot.slane %v429_v12, 4 }
 0x26b   : > { %v431_v14 = vadd.f32 %v430_v13, %v429_v12 }
 0x26c   : > { %v442_v15 = vpop.xlane.xlu0 %441  ;;  %v455_v16 = vpop.xlane.xlu1 %454 }
 0x26d   : > { %v432_v17 = vrot.slane %v431_v14, 2  ;;  %v443_v18 = vrot.slane %v442_v15, 4  ;;  %v456_v19 = vrot.slane %v455_v16, 4 }
 0x26f   : > { %v433_v20 = vadd.f32 %v432_v17, %v431_v14  ;;  %v444_v21 = vadd.f32 %v443_v18, %v442_v15  ;;  %v457_v22 = vadd.f32 %v456_v19, %v455_v16 }
 0x271   : > { %v434_v23 = vrot.slane %v433_v20, 1  ;;  %v445_v24 = vrot.slane %v444_v21, 2  ;;  %v458_v25 = vrot.slane %v457_v22, 2 }
 0x273   : > { %v435_v26 = vadd.f32 %v434_v23, %v433_v20  ;;  %v446_v27 = vadd.f32 %v445_v24, %v444_v21  ;;  %v459_v28 = vadd.f32 %v458_v25, %v457_v22 }
 0x275   : > { %v436_v30 = vmul.f32 0.9999, %v435_v26  ;;  %v447_v31 = vrot.slane %v446_v27, 1  ;;  %v460_v32 = vrot.slane %v459_v28, 1 }
 0x277   : > { %v437_v33 = vadd.f32 %v436_v30, %v427_v29  ;;  %v448_v34 = vadd.f32 %v447_v31, %v446_v27  ;;  %v461_v35 = vadd.f32 %v460_v32, %v459_v28 }
 0x279   : > { %438 = vst [vmem:[#allocation2] sm:$0x1] %v437_v33  ;;  %v449_v38 = vmul.f32 0.014140721, %v448_v34  ;;  %v462_v39 = vmul.f32 0.00014140722, %v461_v35 }
 0x27b   : > { %v450_v40 = vadd.f32 %v449_v38, %v440_v36  ;;  %v463_v41 = vadd.f32 %v462_v39, %v453_v37 }
 0x27d   : > { %451 = vst [vmem:[#allocation2 + $0x1] sm:$0x1] %v450_v40  ;;  %464 = vst [vmem:[#allocation2 + $0x2] sm:$0x1] %v463_v41 }
 0x27e PF: > { %s2092_s6 = sld [smem:[#allocation25_spill]] }
 0x284   : > { %p888_p6 = scmp.ne.s32.totalorder %s2092_s6, 1 }
 0x285   : > { %v469_v42 = vld [vmem:[%s307_s19] sm:$0xff] (!%p888_p6)  ;;  %vm476_vm3 = vcmask (!%p888_p6), 1043456   ;;  %v1487_v43 = vmov (!%p888_p6), 0.0   ;;  %vm1488_vm4 = vmmov (!%p888_p6), 0   ;;  %v524_v45 = vld [vmem:[#allocation2 + $0x2] sm:$0x1] (!%p888_p6) }
 0x286   : > { %468 = sbr.rel (%p888_p6) target bundleno = 1618 (0x652), region = 72  ;;  %912 = vmatprep.subr.bf16.mxu0 (!%p888_p6), %v1487_v43  ;;  %v470_v44 = vpack.c.bf16 (!%p888_p6), %v469_v42, %v469_v42  ;;  %914 = vmatprep.mubr.msk.bf16.mxu0 (!%p888_p6), %vm1488_vm4, %v1487_v43  ;;  %v522_v46 = vld [vmem:[#allocation2 + $0x1] sm:$0x1] (!%p888_p6)  ;;  %v525_v47 = vmul.f32 (!%p888_p6), 1.9996e-08, %v524_v45  ;;  %vm472_vm5 = vcmask (!%p888_p6), 64512  }
 0x287   : > { %v523_v48 = vmul.f32 (!%p888_p6), 0.00019996, %v522_v46  ;;  %v520_v49 = vld [vmem:[#allocation2] sm:$0x1] (!%p888_p6)  ;;  %918 = vmatprep.subr.bf16.mxu1 (!%p888_p6), %v1487_v43  ;;  %920 = vmatprep.mubr.msk.bf16.mxu1 (!%p888_p6), %vm1488_vm4, %v1487_v43  ;;  %v542_v2 = vld [vmem:[#allocation9] sm:$0xf] (!%p888_p6) }
 0x288   : > { %v478_v50 = vsel (!%p888_p6), %vm476_vm3, %v470_v44, 0  ;;  %v521_v51 = vmul.f32 (!%p888_p6), 0.9998, %v520_v49  ;;  %v471_v52 = vld [vmem:[#allocation8] sm:$0xf] (!%p888_p6)  ;;  %924 = vpush (!%p888_p6), %v525_v47  ;;  %s2093_s8 = sld [smem:[#allocation24_spill]] (!%p888_p6) }
 0x289   : > { %913 = vmatpush3.bf16.msra.mxu0 (!%p888_p6), %v478_v50  ;;  %926 = vpush (!%p888_p6), %v523_v48 }
 0x28a   : > { %928 = vpush (!%p888_p6), %v521_v51 }
 0x28c   : > { %915 = vmatmul.mubr.msk.bf16.vlgmr.msra.gmra.mrb[0].mxu0 (!%p888_p6), %vm472_vm5, %v471_v52 }
 0x28e   : > { %p891_p8 = scmp.ne.s32.totalorder %s2093_s8, 0 }
 0x2b9   : > { %s925_s24 = spop %924 }
 0x2ba   : > { %s927_s25 = spop %926  ;;  %v528_v53 = vstv %s925_s24 }
 0x2bb   : > { %v533_v55 = vstv %s927_s25  ;;  %s929_s7 = spop %928 }
 0x2bc   : > { %v539_v61 = vstv %s929_s7 }
 0x35f   : > { %v514_v54 = vpop.f32.mrb[0].mxu0 }
 0x360   : > { %v530_v56 = vmul.f32 %v528_v53, %v514_v54  ;;  %v916_v57 = vpop.f32.mrb[1].mxu0 }
 0x361   : > { %v517_v58 = vpop.f32.mrb[2].mxu0 }
 0x362   : > { %v535_v59 = vadd.f32 %v533_v55, %v530_v56  ;;  %v917_v60 = vpop.f32.mrb[3].mxu0 }
 0x364   : > { %v536_v62 = vmul.f32 %v535_v59, %v514_v54 }
 0x366   : > { %v541_v63 = vadd.f32 %v539_v61, %v536_v62 }
 0x368   : > { %v543_v0 = vpack.c.bf16 %v541_v63, %v541_v63 }
 0x36a   : > { %v548_v1 = vsel %vm476_vm3, %v543_v0, 0 }
 0x36b   : > { %919 = vmatpush3.bf16.msra.mxu1 %v548_v1 }
 0x36e   : > { %921 = vmatmul.mubr.msk.bf16.vlgmr.msra.gmra.mrb[0].mxu1 %vm472_vm5, %v542_v2 }
 0x43e   : > { %592 = sbr.rel (%p891_p8) target bundleno = 1247 (0x4df), region = 76 }
 0x441   : > { %v584_v3 = vpop.f32.mrb[0].mxu1 }
 0x442   : > { %v922_v4 = vpop.f32.mrb[1].mxu1  ;;  %593 = vadd.xlane.f32.xlu0 (!%p891_p8), %v584_v3 }
 0x443   : > { %v587_v5 = vpop.f32.mrb[2].mxu1 }
 0x444   : > { %v923_v6 = vpop.f32.mrb[3].mxu1 }
 0x4cf   : > { %v594_v7 = vpop.xlane.xlu0 %593 }
 0x4d0   : > { %v595_v8 = vrot.slane %v594_v7, 4 }
 0x4d2   : > { %v596_v9 = vadd.f32 %v595_v8, %v594_v7 }
 0x4d4   : > { %v597_v10 = vrot.slane %v596_v9, 2 }
 0x4d6   : > { %v598_v11 = vadd.f32 %v597_v10, %v596_v9 }
 0x4d8   : > { %v599_v12 = vrot.slane %v598_v11, 1 }
 0x4da   : > { %v600_v13 = vadd.f32 %v599_v12, %v598_v11 }
 0x4dc   : > { %v602_v14 = vmul.f32 0.0009765625, %v600_v13 }
 0x4de   : > { %603 = vst [vmem:[#allocation2 + $0x5] sm:$0x1] %v602_v14 }
 0x4df PF: > { %633 = vst [vmem:[%s349_s18] sm:$0xff] %v584_v3  ;;  %v610_v29 = vld [vmem:[#allocation2 + $0x3] sm:$0x1]  ;;  %v621_v34 = vld [vmem:[#allocation2 + $0x4] sm:$0x1]  ;;  %s2094_s4 = sld [smem:[#allocation24_spill]] }
 0x4e5   : > { %v604_v15 = vld [vmem:[#allocation2 + $0x5] sm:$0x1]  ;;  %p892_p9 = scmp.ne.s32.totalorder %s2094_s4, 1 }
 0x4e6   : > { %930 = vpush %v604_v15  ;;  %v651_v45 = vlaneseq (!%p892_p9)  ;;  %v646_v47 = vld [vmem:[#allocation2 + $0x5] sm:$0x1] (!%p892_p9)  ;;  %v650_v51 = vld [vmem:[#allocation11] sm:$0xff] (!%p892_p9)  ;;  %vm666_vm6 = vcmask (!%p892_p9), 7168   ;;  %s1489_s19 = smov (!%p892_p9), 1   ;;  %vm668_vm7 = vcmask (!%p892_p9), 15368  }
 0x4e8   : > { %v652_v46 = vshrl.u32 (!%p892_p9), %v651_v45, 7 }
 0x4ea   : > { %v653_v49 = vsub.s32 (!%p892_p9), 0, %v652_v46 }
 0x517   : > { %s931_s16 = spop %930 }
 0x518   : > { %v607_v16 = vstv %s931_s16 }
 0x519   : > { %v609_v17 = vsub.f32 %v584_v3, %v607_v16 }
 0x51b   : > { %611 = vadd.xlane.f32.xlu0 %v609_v17  ;;  %v622_v18 = vmul.f32 %v609_v17, %v609_v17 }
 0x51f   : > { %623 = vadd.xlane.f32.xlu0 %v622_v18 }
 0x5a8   : > { %v612_v19 = vpop.xlane.xlu0 %611 }
 0x5a9   : > { %v613_v20 = vrot.slane %v612_v19, 4 }
 0x5ab   : > { %v614_v21 = vadd.f32 %v613_v20, %v612_v19 }
 0x5ac   : > { %v624_v22 = vpop.xlane.xlu0 %623 }
 0x5ad   : > { %v615_v23 = vrot.slane %v614_v21, 2  ;;  %v625_v24 = vrot.slane %v624_v22, 4 }
 0x5af   : > { %v616_v25 = vadd.f32 %v615_v23, %v614_v21  ;;  %v626_v26 = vadd.f32 %v625_v24, %v624_v22 }
 0x5b1   : > { %v617_v27 = vrot.slane %v616_v25, 1  ;;  %v627_v28 = vrot.slane %v626_v26, 2 }
 0x5b3   : > { %v618_v30 = vadd.f32 %v617_v27, %v616_v25  ;;  %v628_v31 = vadd.f32 %v627_v28, %v626_v26 }
 0x5b5   : > { %v619_v32 = vadd.f32 %v618_v30, %v610_v29  ;;  %v629_v33 = vrot.slane %v628_v31, 1  ;;  %637 = sbr.rel (%p892_p9) target bundleno = 1618 (0x652), region = 80 }
 0x5b7   : > { %620 = vst [vmem:[#allocation2 + $0x3] sm:$0x1] %v619_v32  ;;  %v630_v35 = vadd.f32 %v629_v33, %v628_v31 }
 0x5b9   : > { %v631_v36 = vadd.f32 %v630_v35, %v621_v34 }
 0x5bb   : > { %632 = vst [vmem:[#allocation2 + $0x4] sm:$0x1] %v631_v36 }
 0x5be   : > { %v638_v37 = vld [vmem:[#allocation2 + $0x3] sm:$0x1] }
 0x5bf   : > { %v640_v39 = vmul.f32 0.00048828125, %v638_v37 }
 0x5c1   : > { %v643_v41 = vmul.f32 %v640_v39, %v640_v39  ;;  %v647_v48 = vadd.f32 %v646_v47, %v640_v39 }
 0x5c2   : > { %v641_v38 = vld [vmem:[#allocation2 + $0x4] sm:$0x1] }
 0x5c3   : > { %v642_v40 = vmul.f32 0.00048828125, %v641_v38  ;;  %v659_v53 = vrot.slane %v647_v48, %v653_v49 }
 0x5c5   : > { %v644_v42 = vsub.f32 %v642_v40, %v643_v41 }
 0x5c7   : > { %v645_v43 = vmax.f32 %v644_v42, 0.0 }
 0x5c9   : > { %v648_v44 = vadd.f32 1e-05, %v645_v43 }
 0x5cb   : > { %1129 = vrsqrt.f32 %v648_v44 }
 0x5d5   : > { %v1130_v50 = vpop.eup %1129 }
 0x5d6   : > { %v654_v52 = vrot.slane %v1130_v50, %v653_v49 }
 0x5d8   : > { %v655_v54 = vmul.f32 %v654_v52, %v650_v51 }
 0x5da   : > { %v660_v55 = vmul.f32 %v659_v53, %v655_v54  ;;  %667 = vst.msk [vmem:[%s1869_s15] sm:$0xff] %vm666_vm6, %v655_v54 }
 0x5dc   : > { %662 = vrot.lane.b32.xlu0 %v660_v55, %s1489_s19 }
 0x64e   : > { %v663_v56 = vpop.permute.xlu0 %662 }
 0x64f   : > { %v665_v57 = vsub.f32 %v650_v51, %v663_v56 }
 0x651   : > { %669 = vst.msk [vmem:[%s1869_s15] sm:$0xff] %vm668_vm7, %v665_v57 }
 0x652 PF: > { %s2095_s21 = sld [smem:[#allocation25_spill]]  ;;  %s2096_s30 = sld [smem:[#allocation24_spill]] }
 0x653   : > { %s2097_s14 = sld [smem:[#allocation26_spill]]  ;;  %s2099_s5 = sld [smem:[#allocation28_spill]] }
 0x654   : > { %s692_s24 = sshll.u32 %s349_s18, 4  ;;  %s2100_s4 = sld [smem:[#allocation41_spill]]  ;;  %s1892_s24 = int_to_ptr.vmem [resolvable:$true] %s692_s24 }
 0x655   : > { %s671_s0 = scalar_lea.sflag [#allocation5], %s347_s22  ;;  %s1273_s11 = scalar_lea.vmem %s1892_s24, 128 }
 0x656   : > { %p1274_p0 = scmp.ne.s32.totalorder %s1892_s24, %s1273_s11  ;;  %s1490_s20 = smov [#allocation12]  }
 0x657   : > { %s1277_s18 = sshll.u32 %s1490_s20, 4  ;;  %s1278_s18 = int_to_ptr.vmem [resolvable:$false] %s1277_s18 }
 0x658   : > { %s683_s13 = smul.u32 %s2096_s30, %s2095_s21  ;;  %s1279_s21 = scalar_lea.vmem %s1278_s18, 256 }
 0x659   : > { %s895_s6 = sshll.u32 %s2097_s14, 1  ;;  %s897_s27 = sshll.u32 %s2097_s14, 7 }
 0x65a   : > { %s688_s25 = sadd.s32 %s895_s6, %s683_s13  ;;  %p2101_p4 = scmp.ne.s32.totalorder %s2099_s5, 0 }
 0x65b   : > { %s896_s7 = sshll.u32 %s688_s25, 7  ;;  %p1280_p1 = scmp.lt.s32.totalorder %s1892_s24, %s1278_s18 }
 0x65c   : > { %s1897_s19 = scalar_lea.hbm %s2100_s4, %s896_s7  ;;  %p1275_p7 = pnand %p1274_p0, %p2101_p4 }
 0x65d   : > { %p1281_p2 = scmp.lt.s32.totalorder %s1279_s21, %s1273_s11 }
 0x65e   : > { %p1276_p11 = pneg %p1275_p7 }
 0x65f   : > { %p1282_p13 = por %p1281_p2, %p1280_p1 }
 0x661   : > { %p1283_p12 = pnand %p1282_p13, %p1276_p11 }
 0x663   : > { %1286 = shalt.err (!%p1283_p12)
}
 0x664   : > { %s1287_s22 = scalar_lea.hbm %s1897_s19, 128  ;;  %s1291_s13 = scalar_lea.hbm %s2100_s4, 512 }
 0x665   : > { %p1288_p10 = scmp.ne.s32.totalorder %s1897_s19, %s1287_s22  ;;  %p1292_p6 = scmp.lt.u32.totalorder %s1897_s19, %s2100_s4 }
 0x666   : > { %p1293_p8 = scmp.lt.u32.totalorder %s1291_s13, %s1287_s22  ;;  %p1295_p0 = scmp.lt.u32.totalorder %s1287_s22, %s1897_s19 }
 0x667   : > { %p1289_p3 = pnand %p1288_p10, %p2101_p4 }
 0x668   : > { %p1294_p9 = por %p1293_p8, %p1292_p6 }
 0x669   : > { %p1290_p5 = pneg %p1289_p3 }
 0x66a   : > { %p1296_p7 = por %p1295_p0, %p1294_p9 }
 0x66c   : > { %p1297_p11 = pnand %p1296_p7, %p1290_p5 }
 0x66e   : > { %1300 = shalt.err (!%p1297_p11)
}
 0x66f   : > { %s2102_s11 = sld [smem:[#allocation21_spill]]  ;;  %s2103_s7 = sld [smem:[#allocation30_spill]] }
 0x670   : > { %950 = dma.vmem_to_hbm [thread:$0]  (%p2101_p4), %s1892_s24, 128, %s1897_s19, %s671_s0  }
 0x671   : > { %s2104_s20 = sld [smem:[#allocation42_spill]]  ;;  %s705_s21 = sshll.u32 %s1869_s15, 4  ;;  %s706_s21 = int_to_ptr.vmem [resolvable:$true] %s705_s21 }
 0x672   : > { %s1301_s3 = scalar_lea.vmem %s706_s21, 128  ;;  %s1491_s5 = smov [#allocation13]  }
 0x673   : > { %p1302_p1 = scmp.ne.s32.totalorder %s706_s21, %s1301_s3  ;;  %s1305_s13 = sshll.u32 %s1491_s5, 4  ;;  %s1306_s13 = int_to_ptr.vmem [resolvable:$false] %s1305_s13 }
 0x674   : > { %s1307_s6 = scalar_lea.vmem %s1306_s13, 256  ;;  %p1308_p4 = scmp.lt.s32.totalorder %s706_s21, %s1306_s13 }
 0x675   : > { %s2105_s22 = sand.u32 1, %s2102_s11   ;;  %p2106_p2 = scmp.ne.s32.totalorder %s2103_s7, 0 }
 0x676   : > { %s676_s30 = scalar_lea.sflag [#allocation14], %s2105_s22  ;;  %p1309_p10 = scmp.lt.s32.totalorder %s1307_s6, %s1301_s3 }
 0x677   : > { %s1928_s18 = scalar_lea.hbm %s2104_s20, %s897_s27  ;;  %p1303_p13 = pnand %p1302_p1, %p2106_p2 }
 0x678   : > { %p1310_p3 = por %p1309_p10, %p1308_p4 }
 0x679   : > { %p1304_p12 = pneg %p1303_p13 }
 0x67b   : > { %p1311_p5 = pnand %p1310_p3, %p1304_p12 }
 0x67d   : > { %1314 = shalt.err (!%p1311_p5)
}
 0x67e   : > { %s1315_s0 = scalar_lea.hbm %s1928_s18, 128  ;;  %s1319_s14 = scalar_lea.hbm %s2104_s20, 256 }
 0x67f   : > { %p1316_p6 = scmp.ne.s32.totalorder %s1928_s18, %s1315_s0  ;;  %p1320_p0 = scmp.lt.u32.totalorder %s1928_s18, %s2104_s20 }
 0x680   : > { %p1321_p7 = scmp.lt.u32.totalorder %s1319_s14, %s1315_s0  ;;  %p1323_p1 = scmp.lt.u32.totalorder %s1315_s0, %s1928_s18 }
 0x681   : > { %p1317_p8 = pnand %p1316_p6, %p2106_p2 }
 0x682   : > { %p1322_p11 = por %p1321_p7, %p1320_p0 }
 0x683   : > { %p1318_p9 = pneg %p1317_p8 }
 0x684   : > { %p1324_p13 = por %p1323_p1, %p1322_p11 }
 0x686   : > { %p1325_p12 = pnand %p1324_p13, %p1318_p9 }
 0x688   : > { %1328 = shalt.err (!%p1325_p12)
}
 0x689   : > { %951 = dma.vmem_to_hbm [thread:$0]  (%p2106_p2), %s706_s21, 128, %s1928_s18, %s676_s30  }
 0x68a PF: > { %s2107_s25 = sld [smem:[#allocation22_spill]]  ;;  %s2108_s11 = sld [smem:[#allocation29_spill]] }
 0x68b   : > { %p987_p4 = scmp.ge.s32.totalorder %s1475_s12, 2 }
 0x690   : > { %s717_s8 = sand.u32 1, %s2107_s25   ;;  %p2109_p10 = scmp.ne.s32.totalorder %s2108_s11, 0 }
 0x691   : > { %s718_s16 = scalar_lea.sflag [#allocation5], %s717_s8 }
 0x692   : > { %p972_p3 = pnand %p987_p4, %p2109_p10 }
 0x694   : > { %1406 = dma.done.wait (!%p972_p3), %s718_s16, 128  }
 0x695   : > { %1408 = vsyncadd (!%p972_p3), %s718_s16, 4294967168  ;;  %s2110_s22 = sld [smem:[#allocation20_spill]] }
 0x696   : > { %s2111_s3 = sld [smem:[#allocation31_spill]] }
 0x69b   : > { %s726_s5 = sand.u32 1, %s2110_s22  }
 0x69c   : > { %p2112_p5 = scmp.ne.s32.totalorder %s2111_s3, 0  ;;  %s727_s13 = scalar_lea.sflag [#allocation14], %s726_s5 }
 0x69e   : > { %p975_p6 = pnand %p987_p4, %p2112_p5 }
 0x6a0   : > { %1410 = dma.done.wait (!%p975_p6), %s727_s13, 128  }
 0x6a1   : > { %1412 = vsyncadd (!%p975_p6), %s727_s13, 4294967168  ;;  %s28_s12 = sadd.s32 1, %s1475_s12   ;;  %s2114_s21 = sld [smem:[#allocation21_spill]] }
 0x6a2   : > { %p1958_p2 = scmp.ge.s32.totalorder %s28_s12, 10   ;;  %s2115_s24 = sld [smem:[#allocation23_spill]] }
 0x6a3   : > { %s2116_s8 = sld [smem:[#allocation27_spill]]  ;;  %s2117_s18 = sld [smem:[#allocation33_spill]] }
 0x6a4   : > { %s2118_s6 = sld [smem:[#allocation34_spill]]  ;;  %s2119_s11 = sld [smem:[#allocation35_spill]] }
 0x6a5   : > { %s2121_s22 = smov %s1423_s23  ;;  %s2122_s23 = smov %s1796_s2 }
 0x6a6   : > { %s2123_s25 = smov %s1435_s26  ;;  %s2124_s26 = smov %s1793_s1 }
 0x6a7   : > { %s2125_s27 = smov %s1443_s28  ;;  %s2126_s28 = smov %s1447_s29 }
 0x6a8   : > { %s2127_s29 = smov %s1790_s17  ;;  %s2128_s30 = smov %s1463_s9 }
 0x6a9   : > { %s2129_s7 = smov %s1467_s10  ;;  %s2130_s9 = smov %s2117_s18 }
 0x6aa   : > { %s2131_s10 = smov %s2118_s6  ;;  %27 = sbr.rel (!%p1958_p2) target bundleno = 23 (0x17), region = 138 }
 0x6b1   :  { %732 = vsyncpa [#allocation4], 1 }
 0x6b2   :  { %734 = vsyncpa [#allocation4 + $0x1], 1 }
 0x6b3   :  { %735 = vsyncpa [#allocation7], 1 }
 0x6b4   :  { %736 = vsyncpa [#allocation10], 1 }
 0x6b5   :  { %737 = vsyncpa [#allocation5], 1 }
 0x6b6   :  { %739 = vsyncpa [#allocation5 + $0x1], 1 }
 0x6b7   :  { %740 = vsyncpa [#allocation14], 1 }
 0x6b8   :  { %742 = vsyncpa [#allocation14 + $0x1], 1 }

</bundles_post_ra>
